<compile_context>
chip_gen: v7x
topology: tpu7x:2x2x1
jax: 0.10.0
libtpu: 0.0.40
codegen_flags: <defaults>
</compile_context>

<pallas_src>
import functools

import jax
import jax.numpy as jnp
from jax.experimental import pallas as pl
from jax.experimental.pallas import tpu as pltpu


def _round_up(x, m):
    return (x + m - 1) // m * m


def gru_net_kernel(x_ref,
                   wxr_ref, wxu_ref, wxn_ref,
                   whr_ref, whu_ref, whn_ref,
                   bxr_ref, bxu_ref, bxn_ref, bhn_ref,
                   wfc_ref, bfc_ref,
                   out_ref, act_ref,
                   h_scr,
                   *, t_blk, b_pad):
    c = pl.program_id(0)

    @pl.when(c == 0)
    def _():
        h_scr[...] = jnp.zeros_like(h_scr)

    # ---- batched input projection for the whole chunk (off the serial path) ----
    x2 = x_ref[...]                                          # (t_blk*b_pad, I)
    xr_all = jnp.dot(x2, wxr_ref[...],
                     preferred_element_type=jnp.float32) + bxr_ref[...]
    xu_all = jnp.dot(x2, wxu_ref[...],
                     preferred_element_type=jnp.float32) + bxu_ref[...]
    xn_all = jnp.dot(x2, wxn_ref[...],
                     preferred_element_type=jnp.float32) + bxn_ref[...]

    whr = whr_ref[...]
    whu = whu_ref[...]
    whn = whn_ref[...]
    bhn = bhn_ref[...]

    # ---- serial recurrence: only h2h matmuls + gate math per step ----
    h = h_scr[...]                                           # (b_pad, H)
    hys = []
    for t in range(t_blk):                                   # static unroll
        r0, r1 = t * b_pad, (t + 1) * b_pad                  # sublane-aligned
        hr = jnp.dot(h, whr, preferred_element_type=jnp.float32)
        hu = jnp.dot(h, whu, preferred_element_type=jnp.float32)
        hn = jnp.dot(h, whn, preferred_element_type=jnp.float32) + bhn
        reset_gate = jax.nn.sigmoid(xr_all[r0:r1, :] + hr)
        update_gate = jax.nn.sigmoid(xu_all[r0:r1, :] + hu)
        new_gate = jnp.tanh(xn_all[r0:r1, :] + reset_gate * hn)
        h = update_gate * h + (1.0 - update_gate) * new_gate
        hys.append(h)

    h_scr[...] = h

    acts = jnp.concatenate(hys, axis=0)                      # (t_blk*b_pad, H)
    act_ref[...] = acts.astype(act_ref.dtype)

    # ---- batched output projection for the whole chunk ----
    out_ref[...] = (jnp.dot(acts, wfc_ref[...],
                            preferred_element_type=jnp.float32)
                    + bfc_ref[...]).astype(out_ref.dtype)


def net5_forward(x, params, *, t_blk=None):
    """x: (T, B, input_size) float32. Returns (out, rnn_activity)."""
    T, B, I = x.shape
    wx, bx, wh, bh, wfc, bfc = params
    H = wh.shape[1]                    # wh is (3H, H)
    O = wfc.shape[0]                   # wfc is (O, H)

    if t_blk is None:
        t_blk = T
    assert T % t_blk == 0, "T must be divisible by the time chunk size"
    n_chunks = T // t_blk

    # Pad batch to a sublane multiple (>= 8) so per-step row slices are aligned.
    b_pad = _round_up(max(B, 8), 8)
    x_p = jnp.pad(x, ((0, 0), (0, b_pad - B), (0, 0)))
    x2 = x_p.reshape(T * b_pad, I)

    # Per-gate weight splits, pre-transposed to (in_features, H).
    wxr, wxu, wxn = wx[0:H].T, wx[H:2 * H].T, wx[2 * H:3 * H].T
    whr, whu, whn = wh[0:H].T, wh[H:2 * H].T, wh[2 * H:3 * H].T
    bxr, bxu, bxn = bx[0:H], bx[H:2 * H], bx[2 * H:3 * H]
    bhr, bhu, bhn = bh[0:H], bh[H:2 * H], bh[2 * H:3 * H]
    # Fold h-side bias into x-side for reset/update gates only; bh_new is
    # multiplied by the reset gate and must stay with the h2h term.
    bxr_f = (bxr + bhr).reshape(1, H)
    bxu_f = (bxu + bhu).reshape(1, H)
    bxn_2 = bxn.reshape(1, H)
    bhn_2 = bhn.reshape(1, H)
    wfc_t = wfc.T                       # (H, O)
    bfc_2 = bfc.reshape(1, O)

    rows = t_blk * b_pad
    full = lambda c: (0, 0)

    kernel = functools.partial(gru_net_kernel, t_blk=t_blk, b_pad=b_pad)

    out2, act2 = pl.pallas_call(
        kernel,
        out_shape=(
            jax.ShapeDtypeStruct((T * b_pad, O), jnp.float32),
            jax.ShapeDtypeStruct((T * b_pad, H), jnp.float32),
        ),
        grid_spec=pltpu.PrefetchScalarGridSpec(
            num_scalar_prefetch=0,
            grid=(n_chunks,),
            in_specs=[
                pl.BlockSpec((rows, I), lambda c: (c, 0)),   # x chunk
                pl.BlockSpec((I, H), full),                  # wx reset^T
                pl.BlockSpec((I, H), full),                  # wx update^T
                pl.BlockSpec((I, H), full),                  # wx new^T
                pl.BlockSpec((H, H), full),                  # wh reset^T
                pl.BlockSpec((H, H), full),                  # wh update^T
                pl.BlockSpec((H, H), full),                  # wh new^T
                pl.BlockSpec((1, H), full),                  # bx_r + bh_r
                pl.BlockSpec((1, H), full),                  # bx_u + bh_u
                pl.BlockSpec((1, H), full),                  # bx_n
                pl.BlockSpec((1, H), full),                  # bh_n
                pl.BlockSpec((H, O), full),                  # wfc^T
                pl.BlockSpec((1, O), full),                  # bfc
            ],
            out_specs=[
                pl.BlockSpec((rows, O), lambda c: (c, 0)),
                pl.BlockSpec((rows, H), lambda c: (c, 0)),
            ],
            scratch_shapes=[pltpu.VMEM((b_pad, H), jnp.float32)],
        ),
        compiler_params=pltpu.CompilerParams(
            dimension_semantics=("arbitrary",)),   # sequential: h carried in scratch
    )(x2, wxr, wxu, wxn, whr, whu, whn, bxr_f, bxu_f, bxn_2, bhn_2, wfc_t, bfc_2)

    out = out2.reshape(T, b_pad, O)[:, :B, :]
    act = act2.reshape(T, b_pad, H)[:, :B, :]
    return out, act


def init_params(key, input_size, hidden_size, output_size):
    std = 1.0 / jnp.sqrt(hidden_size)
    ks = jax.random.split(key, 6)
    wx = jax.random.uniform(ks[0], (3 * hidden_size, input_size), jnp.float32, -std, std)
    bx = jax.random.uniform(ks[1], (3 * hidden_size,), jnp.float32, -std, std)
    wh = jax.random.uniform(ks[2], (3 * hidden_size, hidden_size), jnp.float32, -std, std)
    bh = jax.random.uniform(ks[3], (3 * hidden_size,), jnp.float32, -std, std)
    std_fc = 1.0 / jnp.sqrt(hidden_size)
    wfc = jax.random.uniform(ks[4], (output_size, hidden_size), jnp.float32, -std_fc, std_fc)
    bfc = jax.random.uniform(ks[5], (output_size,), jnp.float32, -std_fc, std_fc)
    return (wx, bx, wh, bh, wfc, bfc)


def net5_reference(x, params):
    """Pure-JAX reference of the PyTorch forward for validation."""
    wx, bx, wh, bh, wfc, bfc = params
    T, B, I = x.shape
    H = wh.shape[1]
    h = jnp.zeros((B, H), jnp.float32)

    def step(h, x_t):
        x_lin = x_t @ wx.T + bx
        h_lin = h @ wh.T + bh
        xr, xu, xn = jnp.split(x_lin, 3, axis=1)
        hr, hu, hn = jnp.split(h_lin, 3, axis=1)
        r = jax.nn.sigmoid(xr + hr)
        u = jax.nn.sigmoid(xu + hu)
        n = jnp.tanh(xn + r * hn)
        hy = u * h + (1 - u) * n
        return hy, hy

    _, act = jax.lax.scan(step, h, x)
    out = act @ wfc.T + bfc
    return out, act


if __name__ == "__main__":
    T, B = 8, 4
    input_size, hidden_size, output_size = 16, 32, 8

    key = jax.random.PRNGKey(0)
    kx, kp = jax.random.split(key)
    x = jax.random.normal(kx, (T, B, input_size), jnp.float32)
    params = init_params(kp, input_size, hidden_size, output_size)

    out, act = net5_forward(x, params)
    out = jax.block_until_ready(out)
    act = jax.block_until_ready(act)

    out_ref, act_ref = net5_reference(x, params)
    assert jnp.allclose(out, out_ref, atol=1e-4, rtol=1e-4)
    assert jnp.allclose(act, act_ref, atol=1e-4, rtol=1e-4)

    print("KERNEL_OK")
</pallas_src>

<mosaic_0001>
module attributes {stable_mosaic.version = 11 : i64} {
  func.func @gru_net_kernel(%arg0: i32, %arg1: memref<64x16xf32, #tpu.memory_space<vmem>>, %arg2: memref<16x32xf32, #tpu.memory_space<vmem>>, %arg3: memref<16x32xf32, #tpu.memory_space<vmem>>, %arg4: memref<16x32xf32, #tpu.memory_space<vmem>>, %arg5: memref<32x32xf32, #tpu.memory_space<vmem>>, %arg6: memref<32x32xf32, #tpu.memory_space<vmem>>, %arg7: memref<32x32xf32, #tpu.memory_space<vmem>>, %arg8: memref<1x32xf32, #tpu.memory_space<vmem>>, %arg9: memref<1x32xf32, #tpu.memory_space<vmem>>, %arg10: memref<1x32xf32, #tpu.memory_space<vmem>>, %arg11: memref<1x32xf32, #tpu.memory_space<vmem>>, %arg12: memref<32x8xf32, #tpu.memory_space<vmem>>, %arg13: memref<1x8xf32, #tpu.memory_space<vmem>>, %arg14: memref<64x8xf32, #tpu.memory_space<vmem>>, %arg15: memref<64x32xf32, #tpu.memory_space<vmem>>, %arg16: memref<8x32xf32, #tpu.memory_space<vmem>>) attributes {dimension_semantics = [#tpu.dimension_semantics<arbitrary>], iteration_bounds = array<i64: 1>, scalar_prefetch = 0 : i64, scratch_operands = 1 : i64, tpu.core_type = #tpu.core_type<tc>, window_params = [{transform_indices = @transform_0, window_bounds = array<i64: 64, 16>}, {pipeline_mode = #tpu.pipeline_mode<synchronous>, transform_indices = @transform_1, window_bounds = array<i64: 16, 32>}, {pipeline_mode = #tpu.pipeline_mode<synchronous>, transform_indices = @transform_2, window_bounds = array<i64: 16, 32>}, {pipeline_mode = #tpu.pipeline_mode<synchronous>, transform_indices = @transform_3, window_bounds = array<i64: 16, 32>}, {pipeline_mode = #tpu.pipeline_mode<synchronous>, transform_indices = @transform_4, window_bounds = array<i64: 32, 32>}, {pipeline_mode = #tpu.pipeline_mode<synchronous>, transform_indices = @transform_5, window_bounds = array<i64: 32, 32>}, {pipeline_mode = #tpu.pipeline_mode<synchronous>, transform_indices = @transform_6, window_bounds = array<i64: 32, 32>}, {pipeline_mode = #tpu.pipeline_mode<synchronous>, transform_indices = @transform_7, window_bounds = array<i64: 1, 32>}, {pipeline_mode = #tpu.pipeline_mode<synchronous>, transform_indices = @transform_8, window_bounds = array<i64: 1, 32>}, {pipeline_mode = #tpu.pipeline_mode<synchronous>, transform_indices = @transform_9, window_bounds = array<i64: 1, 32>}, {pipeline_mode = #tpu.pipeline_mode<synchronous>, transform_indices = @transform_10, window_bounds = array<i64: 1, 32>}, {pipeline_mode = #tpu.pipeline_mode<synchronous>, transform_indices = @transform_11, window_bounds = array<i64: 32, 8>}, {pipeline_mode = #tpu.pipeline_mode<synchronous>, transform_indices = @transform_12, window_bounds = array<i64: 1, 8>}, {transform_indices = @transform_13, window_bounds = array<i64: 64, 8>}, {transform_indices = @transform_14, window_bounds = array<i64: 64, 32>}]} {
    %c0_i32 = arith.constant 0 : i32
    %0 = arith.cmpi eq, %arg0, %c0_i32 : i32
    %1 = arith.extui %0 : i1 to i32
    %c0_i32_0 = arith.constant 0 : i32
    %2 = arith.cmpi ne, %1, %c0_i32_0 : i32
    scf.if %2 {
      %cst_85 = arith.constant 0.000000e+00 : f32
      %257 = vector.broadcast %cst_85 : f32 to vector<8x32xf32>
      %c0_86 = arith.constant 0 : index
      %c0_87 = arith.constant 0 : index
      %258 = vector.load %arg16[%c0_86, %c0_87] : memref<8x32xf32, #tpu.memory_space<vmem>>, vector<8x32xf32>
      tpu.vector_store %arg16[%c0_86, %c0_87], %257 {strides = array<i32>} : memref<8x32xf32, #tpu.memory_space<vmem>>, vector<8x32xf32>,
    } else {
    }
    %c0 = arith.constant 0 : index
    %c0_1 = arith.constant 0 : index
    %3 = vector.load %arg1[%c0, %c0_1] : memref<64x16xf32, #tpu.memory_space<vmem>>, vector<64x16xf32>
    %c0_2 = arith.constant 0 : index
    %c0_3 = arith.constant 0 : index
    %4 = vector.load %arg2[%c0_2, %c0_3] : memref<16x32xf32, #tpu.memory_space<vmem>>, vector<16x32xf32>
    %cst = arith.constant dense<0.000000e+00> : vector<64x32xf32>
    %5 = tpu.matmul %3, %4, %cst {dimension_numbers = #tpu.dot_dimension_numbers<[1], [0], [0], [1], [0, 0, 1, 1], [], []>} : vector<64x16xf32>, vector<16x32xf32>, vector<64x32xf32> -> vector<64x32xf32>
    %c0_4 = arith.constant 0 : index
    %c0_5 = arith.constant 0 : index
    %6 = vector.load %arg8[%c0_4, %c0_5] : memref<1x32xf32, #tpu.memory_space<vmem>>, vector<1x32xf32>
    %7 = vector.broadcast %6 : vector<1x32xf32> to vector<64x32xf32>
    %8 = arith.addf %5, %7 : vector<64x32xf32>
    %c0_6 = arith.constant 0 : index
    %c0_7 = arith.constant 0 : index
    %9 = vector.load %arg3[%c0_6, %c0_7] : memref<16x32xf32, #tpu.memory_space<vmem>>, vector<16x32xf32>
    %cst_8 = arith.constant dense<0.000000e+00> : vector<64x32xf32>
    %10 = tpu.matmul %3, %9, %cst_8 {dimension_numbers = #tpu.dot_dimension_numbers<[1], [0], [0], [1], [0, 0, 1, 1], [], []>} : vector<64x16xf32>, vector<16x32xf32>, vector<64x32xf32> -> vector<64x32xf32>
    %c0_9 = arith.constant 0 : index
    %c0_10 = arith.constant 0 : index
    %11 = vector.load %arg9[%c0_9, %c0_10] : memref<1x32xf32, #tpu.memory_space<vmem>>, vector<1x32xf32>
    %12 = vector.broadcast %11 : vector<1x32xf32> to vector<64x32xf32>
    %13 = arith.addf %10, %12 : vector<64x32xf32>
    %c0_11 = arith.constant 0 : index
    %c0_12 = arith.constant 0 : index
    %14 = vector.load %arg4[%c0_11, %c0_12] : memref<16x32xf32, #tpu.memory_space<vmem>>, vector<16x32xf32>
    %cst_13 = arith.constant dense<0.000000e+00> : vector<64x32xf32>
    %15 = tpu.matmul %3, %14, %cst_13 {dimension_numbers = #tpu.dot_dimension_numbers<[1], [0], [0], [1], [0, 0, 1, 1], [], []>} : vector<64x16xf32>, vector<16x32xf32>, vector<64x32xf32> -> vector<64x32xf32>
    %c0_14 = arith.constant 0 : index
    %c0_15 = arith.constant 0 : index
    %16 = vector.load %arg10[%c0_14, %c0_15] : memref<1x32xf32, #tpu.memory_space<vmem>>, vector<1x32xf32>
    %17 = vector.broadcast %16 : vector<1x32xf32> to vector<64x32xf32>
    %18 = arith.addf %15, %17 : vector<64x32xf32>
    %c0_16 = arith.constant 0 : index
    %c0_17 = arith.constant 0 : index
    %19 = vector.load %arg5[%c0_16, %c0_17] : memref<32x32xf32, #tpu.memory_space<vmem>>, vector<32x32xf32>
    %c0_18 = arith.constant 0 : index
    %c0_19 = arith.constant 0 : index
    %20 = vector.load %arg6[%c0_18, %c0_19] : memref<32x32xf32, #tpu.memory_space<vmem>>, vector<32x32xf32>
    %c0_20 = arith.constant 0 : index
    %c0_21 = arith.constant 0 : index
    %21 = vector.load %arg7[%c0_20, %c0_21] : memref<32x32xf32, #tpu.memory_space<vmem>>, vector<32x32xf32>
    %c0_22 = arith.constant 0 : index
    %c0_23 = arith.constant 0 : index
    %22 = vector.load %arg11[%c0_22, %c0_23] : memref<1x32xf32, #tpu.memory_space<vmem>>, vector<1x32xf32>
    %c0_24 = arith.constant 0 : index
    %c0_25 = arith.constant 0 : index
    %23 = vector.load %arg16[%c0_24, %c0_25] : memref<8x32xf32, #tpu.memory_space<vmem>>, vector<8x32xf32>
    %cst_26 = arith.constant dense<0.000000e+00> : vector<8x32xf32>
    %24 = tpu.matmul %23, %19, %cst_26 {dimension_numbers = #tpu.dot_dimension_numbers<[1], [0], [0], [1], [0, 0, 1, 1], [], []>} : vector<8x32xf32>, vector<32x32xf32>, vector<8x32xf32> -> vector<8x32xf32>
    %cst_27 = arith.constant dense<0.000000e+00> : vector<8x32xf32>
    %25 = tpu.matmul %23, %20, %cst_27 {dimension_numbers = #tpu.dot_dimension_numbers<[1], [0], [0], [1], [0, 0, 1, 1], [], []>} : vector<8x32xf32>, vector<32x32xf32>, vector<8x32xf32> -> vector<8x32xf32>
    %cst_28 = arith.constant dense<0.000000e+00> : vector<8x32xf32>
    %26 = tpu.matmul %23, %21, %cst_28 {dimension_numbers = #tpu.dot_dimension_numbers<[1], [0], [0], [1], [0, 0, 1, 1], [], []>} : vector<8x32xf32>, vector<32x32xf32>, vector<8x32xf32> -> vector<8x32xf32>
    %27 = vector.broadcast %22 : vector<1x32xf32> to vector<8x32xf32>
    %28 = arith.addf %26, %27 : vector<8x32xf32>
    %29 = vector.extract_strided_slice %8 {offsets = [0, 0], sizes = [8, 32], strides = [1, 1]} : vector<64x32xf32> to vector<8x32xf32>
    %30 = arith.addf %29, %24 : vector<8x32xf32>
    %31 = arith.negf %30 : vector<8x32xf32>
    %32 = math.exp %31 : vector<8x32xf32>
    %cst_29 = arith.constant 1.000000e+00 : f32
    %33 = vector.broadcast %cst_29 : f32 to vector<8x32xf32>
    %34 = arith.addf %33, %32 : vector<8x32xf32>
    %35 = arith.divf %33, %34 : vector<8x32xf32>
    %36 = vector.extract_strided_slice %13 {offsets = [0, 0], sizes = [8, 32], strides = [1, 1]} : vector<64x32xf32> to vector<8x32xf32>
    %37 = arith.addf %36, %25 : vector<8x32xf32>
    %38 = arith.negf %37 : vector<8x32xf32>
    %39 = math.exp %38 : vector<8x32xf32>
    %cst_30 = arith.constant 1.000000e+00 : f32
    %40 = vector.broadcast %cst_30 : f32 to vector<8x32xf32>
    %41 = arith.addf %40, %39 : vector<8x32xf32>
    %42 = arith.divf %40, %41 : vector<8x32xf32>
    %43 = vector.extract_strided_slice %18 {offsets = [0, 0], sizes = [8, 32], strides = [1, 1]} : vector<64x32xf32> to vector<8x32xf32>
    %44 = arith.mulf %35, %28 : vector<8x32xf32>
    %45 = arith.addf %43, %44 : vector<8x32xf32>
    %46 = math.tanh %45 : vector<8x32xf32>
    %47 = arith.mulf %42, %23 : vector<8x32xf32>
    %cst_31 = arith.constant 1.000000e+00 : f32
    %48 = vector.broadcast %cst_31 : f32 to vector<8x32xf32>
    %49 = arith.subf %48, %42 : vector<8x32xf32>
    %50 = arith.mulf %49, %46 : vector<8x32xf32>
    %51 = arith.addf %47, %50 : vector<8x32xf32>
    %cst_32 = arith.constant dense<0.000000e+00> : vector<8x32xf32>
    %52 = tpu.matmul %51, %19, %cst_32 {dimension_numbers = #tpu.dot_dimension_numbers<[1], [0], [0], [1], [0, 0, 1, 1], [], []>} : vector<8x32xf32>, vector<32x32xf32>, vector<8x32xf32> -> vector<8x32xf32>
    %cst_33 = arith.constant dense<0.000000e+00> : vector<8x32xf32>
    %53 = tpu.matmul %51, %20, %cst_33 {dimension_numbers = #tpu.dot_dimension_numbers<[1], [0], [0], [1], [0, 0, 1, 1], [], []>} : vector<8x32xf32>, vector<32x32xf32>, vector<8x32xf32> -> vector<8x32xf32>
    %cst_34 = arith.constant dense<0.000000e+00> : vector<8x32xf32>
    %54 = tpu.matmul %51, %21, %cst_34 {dimension_numbers = #tpu.dot_dimension_numbers<[1], [0], [0], [1], [0, 0, 1, 1], [], []>} : vector<8x32xf32>, vector<32x32xf32>, vector<8x32xf32> -> vector<8x32xf32>
    %55 = vector.broadcast %22 : vector<1x32xf32> to vector<8x32xf32>
    %56 = arith.addf %54, %55 : vector<8x32xf32>
    %57 = vector.extract_strided_slice %8 {offsets = [8, 0], sizes = [8, 32], strides = [1, 1]} : vector<64x32xf32> to vector<8x32xf32>
    %58 = arith.addf %57, %52 : vector<8x32xf32>
    %59 = arith.negf %58 : vector<8x32xf32>
    %60 = math.exp %59 : vector<8x32xf32>
    %cst_35 = arith.constant 1.000000e+00 : f32
    %61 = vector.broadcast %cst_35 : f32 to vector<8x32xf32>
    %62 = arith.addf %61, %60 : vector<8x32xf32>
    %63 = arith.divf %61, %62 : vector<8x32xf32>
    %64 = vector.extract_strided_slice %13 {offsets = [8, 0], sizes = [8, 32], strides = [1, 1]} : vector<64x32xf32> to vector<8x32xf32>
    %65 = arith.addf %64, %53 : vector<8x32xf32>
    %66 = arith.negf %65 : vector<8x32xf32>
    %67 = math.exp %66 : vector<8x32xf32>
    %cst_36 = arith.constant 1.000000e+00 : f32
    %68 = vector.broadcast %cst_36 : f32 to vector<8x32xf32>
    %69 = arith.addf %68, %67 : vector<8x32xf32>
    %70 = arith.divf %68, %69 : vector<8x32xf32>
    %71 = vector.extract_strided_slice %18 {offsets = [8, 0], sizes = [8, 32], strides = [1, 1]} : vector<64x32xf32> to vector<8x32xf32>
    %72 = arith.mulf %63, %56 : vector<8x32xf32>
    %73 = arith.addf %71, %72 : vector<8x32xf32>
    %74 = math.tanh %73 : vector<8x32xf32>
    %75 = arith.mulf %70, %51 : vector<8x32xf32>
    %cst_37 = arith.constant 1.000000e+00 : f32
    %76 = vector.broadcast %cst_37 : f32 to vector<8x32xf32>
    %77 = arith.subf %76, %70 : vector<8x32xf32>
    %78 = arith.mulf %77, %74 : vector<8x32xf32>
    %79 = arith.addf %75, %78 : vector<8x32xf32>
    %cst_38 = arith.constant dense<0.000000e+00> : vector<8x32xf32>
    %80 = tpu.matmul %79, %19, %cst_38 {dimension_numbers = #tpu.dot_dimension_numbers<[1], [0], [0], [1], [0, 0, 1, 1], [], []>} : vector<8x32xf32>, vector<32x32xf32>, vector<8x32xf32> -> vector<8x32xf32>
    %cst_39 = arith.constant dense<0.000000e+00> : vector<8x32xf32>
    %81 = tpu.matmul %79, %20, %cst_39 {dimension_numbers = #tpu.dot_dimension_numbers<[1], [0], [0], [1], [0, 0, 1, 1], [], []>} : vector<8x32xf32>, vector<32x32xf32>, vector<8x32xf32> -> vector<8x32xf32>
    %cst_40 = arith.constant dense<0.000000e+00> : vector<8x32xf32>
    %82 = tpu.matmul %79, %21, %cst_40 {dimension_numbers = #tpu.dot_dimension_numbers<[1], [0], [0], [1], [0, 0, 1, 1], [], []>} : vector<8x32xf32>, vector<32x32xf32>, vector<8x32xf32> -> vector<8x32xf32>
    %83 = vector.broadcast %22 : vector<1x32xf32> to vector<8x32xf32>
    %84 = arith.addf %82, %83 : vector<8x32xf32>
    %85 = vector.extract_strided_slice %8 {offsets = [16, 0], sizes = [8, 32], strides = [1, 1]} : vector<64x32xf32> to vector<8x32xf32>
    %86 = arith.addf %85, %80 : vector<8x32xf32>
    %87 = arith.negf %86 : vector<8x32xf32>
    %88 = math.exp %87 : vector<8x32xf32>
    %cst_41 = arith.constant 1.000000e+00 : f32
    %89 = vector.broadcast %cst_41 : f32 to vector<8x32xf32>
    %90 = arith.addf %89, %88 : vector<8x32xf32>
    %91 = arith.divf %89, %90 : vector<8x32xf32>
    %92 = vector.extract_strided_slice %13 {offsets = [16, 0], sizes = [8, 32], strides = [1, 1]} : vector<64x32xf32> to vector<8x32xf32>
    %93 = arith.addf %92, %81 : vector<8x32xf32>
    %94 = arith.negf %93 : vector<8x32xf32>
    %95 = math.exp %94 : vector<8x32xf32>
    %cst_42 = arith.constant 1.000000e+00 : f32
    %96 = vector.broadcast %cst_42 : f32 to vector<8x32xf32>
    %97 = arith.addf %96, %95 : vector<8x32xf32>
    %98 = arith.divf %96, %97 : vector<8x32xf32>
    %99 = vector.extract_strided_slice %18 {offsets = [16, 0], sizes = [8, 32], strides = [1, 1]} : vector<64x32xf32> to vector<8x32xf32>
    %100 = arith.mulf %91, %84 : vector<8x32xf32>
    %101 = arith.addf %99, %100 : vector<8x32xf32>
    %102 = math.tanh %101 : vector<8x32xf32>
    %103 = arith.mulf %98, %79 : vector<8x32xf32>
    %cst_43 = arith.constant 1.000000e+00 : f32
    %104 = vector.broadcast %cst_43 : f32 to vector<8x32xf32>
    %105 = arith.subf %104, %98 : vector<8x32xf32>
    %106 = arith.mulf %105, %102 : vector<8x32xf32>
    %107 = arith.addf %103, %106 : vector<8x32xf32>
    %cst_44 = arith.constant dense<0.000000e+00> : vector<8x32xf32>
    %108 = tpu.matmul %107, %19, %cst_44 {dimension_numbers = #tpu.dot_dimension_numbers<[1], [0], [0], [1], [0, 0, 1, 1], [], []>} : vector<8x32xf32>, vector<32x32xf32>, vector<8x32xf32> -> vector<8x32xf32>
    %cst_45 = arith.constant dense<0.000000e+00> : vector<8x32xf32>
    %109 = tpu.matmul %107, %20, %cst_45 {dimension_numbers = #tpu.dot_dimension_numbers<[1], [0], [0], [1], [0, 0, 1, 1], [], []>} : vector<8x32xf32>, vector<32x32xf32>, vector<8x32xf32> -> vector<8x32xf32>
    %cst_46 = arith.constant dense<0.000000e+00> : vector<8x32xf32>
    %110 = tpu.matmul %107, %21, %cst_46 {dimension_numbers = #tpu.dot_dimension_numbers<[1], [0], [0], [1], [0, 0, 1, 1], [], []>} : vector<8x32xf32>, vector<32x32xf32>, vector<8x32xf32> -> vector<8x32xf32>
    %111 = vector.broadcast %22 : vector<1x32xf32> to vector<8x32xf32>
    %112 = arith.addf %110, %111 : vector<8x32xf32>
    %113 = vector.extract_strided_slice %8 {offsets = [24, 0], sizes = [8, 32], strides = [1, 1]} : vector<64x32xf32> to vector<8x32xf32>
    %114 = arith.addf %113, %108 : vector<8x32xf32>
    %115 = arith.negf %114 : vector<8x32xf32>
    %116 = math.exp %115 : vector<8x32xf32>
    %cst_47 = arith.constant 1.000000e+00 : f32
    %117 = vector.broadcast %cst_47 : f32 to vector<8x32xf32>
    %118 = arith.addf %117, %116 : vector<8x32xf32>
    %119 = arith.divf %117, %118 : vector<8x32xf32>
    %120 = vector.extract_strided_slice %13 {offsets = [24, 0], sizes = [8, 32], strides = [1, 1]} : vector<64x32xf32> to vector<8x32xf32>
    %121 = arith.addf %120, %109 : vector<8x32xf32>
    %122 = arith.negf %121 : vector<8x32xf32>
    %123 = math.exp %122 : vector<8x32xf32>
    %cst_48 = arith.constant 1.000000e+00 : f32
    %124 = vector.broadcast %cst_48 : f32 to vector<8x32xf32>
    %125 = arith.addf %124, %123 : vector<8x32xf32>
    %126 = arith.divf %124, %125 : vector<8x32xf32>
    %127 = vector.extract_strided_slice %18 {offsets = [24, 0], sizes = [8, 32], strides = [1, 1]} : vector<64x32xf32> to vector<8x32xf32>
    %128 = arith.mulf %119, %112 : vector<8x32xf32>
    %129 = arith.addf %127, %128 : vector<8x32xf32>
    %130 = math.tanh %129 : vector<8x32xf32>
    %131 = arith.mulf %126, %107 : vector<8x32xf32>
    %cst_49 = arith.constant 1.000000e+00 : f32
    %132 = vector.broadcast %cst_49 : f32 to vector<8x32xf32>
    %133 = arith.subf %132, %126 : vector<8x32xf32>
    %134 = arith.mulf %133, %130 : vector<8x32xf32>
    %135 = arith.addf %131, %134 : vector<8x32xf32>
    %cst_50 = arith.constant dense<0.000000e+00> : vector<8x32xf32>
    %136 = tpu.matmul %135, %19, %cst_50 {dimension_numbers = #tpu.dot_dimension_numbers<[1], [0], [0], [1], [0, 0, 1, 1], [], []>} : vector<8x32xf32>, vector<32x32xf32>, vector<8x32xf32> -> vector<8x32xf32>
    %cst_51 = arith.constant dense<0.000000e+00> : vector<8x32xf32>
    %137 = tpu.matmul %135, %20, %cst_51 {dimension_numbers = #tpu.dot_dimension_numbers<[1], [0], [0], [1], [0, 0, 1, 1], [], []>} : vector<8x32xf32>, vector<32x32xf32>, vector<8x32xf32> -> vector<8x32xf32>
    %cst_52 = arith.constant dense<0.000000e+00> : vector<8x32xf32>
    %138 = tpu.matmul %135, %21, %cst_52 {dimension_numbers = #tpu.dot_dimension_numbers<[1], [0], [0], [1], [0, 0, 1, 1], [], []>} : vector<8x32xf32>, vector<32x32xf32>, vector<8x32xf32> -> vector<8x32xf32>
    %139 = vector.broadcast %22 : vector<1x32xf32> to vector<8x32xf32>
    %140 = arith.addf %138, %139 : vector<8x32xf32>
    %141 = vector.extract_strided_slice %8 {offsets = [32, 0], sizes = [8, 32], strides = [1, 1]} : vector<64x32xf32> to vector<8x32xf32>
    %142 = arith.addf %141, %136 : vector<8x32xf32>
    %143 = arith.negf %142 : vector<8x32xf32>
    %144 = math.exp %143 : vector<8x32xf32>
    %cst_53 = arith.constant 1.000000e+00 : f32
    %145 = vector.broadcast %cst_53 : f32 to vector<8x32xf32>
    %146 = arith.addf %145, %144 : vector<8x32xf32>
    %147 = arith.divf %145, %146 : vector<8x32xf32>
    %148 = vector.extract_strided_slice %13 {offsets = [32, 0], sizes = [8, 32], strides = [1, 1]} : vector<64x32xf32> to vector<8x32xf32>
    %149 = arith.addf %148, %137 : vector<8x32xf32>
    %150 = arith.negf %149 : vector<8x32xf32>
    %151 = math.exp %150 : vector<8x32xf32>
    %cst_54 = arith.constant 1.000000e+00 : f32
    %152 = vector.broadcast %cst_54 : f32 to vector<8x32xf32>
    %153 = arith.addf %152, %151 : vector<8x32xf32>
    %154 = arith.divf %152, %153 : vector<8x32xf32>
    %155 = vector.extract_strided_slice %18 {offsets = [32, 0], sizes = [8, 32], strides = [1, 1]} : vector<64x32xf32> to vector<8x32xf32>
    %156 = arith.mulf %147, %140 : vector<8x32xf32>
    %157 = arith.addf %155, %156 : vector<8x32xf32>
    %158 = math.tanh %157 : vector<8x32xf32>
    %159 = arith.mulf %154, %135 : vector<8x32xf32>
    %cst_55 = arith.constant 1.000000e+00 : f32
    %160 = vector.broadcast %cst_55 : f32 to vector<8x32xf32>
    %161 = arith.subf %160, %154 : vector<8x32xf32>
    %162 = arith.mulf %161, %158 : vector<8x32xf32>
    %163 = arith.addf %159, %162 : vector<8x32xf32>
    %cst_56 = arith.constant dense<0.000000e+00> : vector<8x32xf32>
    %164 = tpu.matmul %163, %19, %cst_56 {dimension_numbers = #tpu.dot_dimension_numbers<[1], [0], [0], [1], [0, 0, 1, 1], [], []>} : vector<8x32xf32>, vector<32x32xf32>, vector<8x32xf32> -> vector<8x32xf32>
    %cst_57 = arith.constant dense<0.000000e+00> : vector<8x32xf32>
    %165 = tpu.matmul %163, %20, %cst_57 {dimension_numbers = #tpu.dot_dimension_numbers<[1], [0], [0], [1], [0, 0, 1, 1], [], []>} : vector<8x32xf32>, vector<32x32xf32>, vector<8x32xf32> -> vector<8x32xf32>
    %cst_58 = arith.constant dense<0.000000e+00> : vector<8x32xf32>
    %166 = tpu.matmul %163, %21, %cst_58 {dimension_numbers = #tpu.dot_dimension_numbers<[1], [0], [0], [1], [0, 0, 1, 1], [], []>} : vector<8x32xf32>, vector<32x32xf32>, vector<8x32xf32> -> vector<8x32xf32>
    %167 = vector.broadcast %22 : vector<1x32xf32> to vector<8x32xf32>
    %168 = arith.addf %166, %167 : vector<8x32xf32>
    %169 = vector.extract_strided_slice %8 {offsets = [40, 0], sizes = [8, 32], strides = [1, 1]} : vector<64x32xf32> to vector<8x32xf32>
    %170 = arith.addf %169, %164 : vector<8x32xf32>
    %171 = arith.negf %170 : vector<8x32xf32>
    %172 = math.exp %171 : vector<8x32xf32>
    %cst_59 = arith.constant 1.000000e+00 : f32
    %173 = vector.broadcast %cst_59 : f32 to vector<8x32xf32>
    %174 = arith.addf %173, %172 : vector<8x32xf32>
    %175 = arith.divf %173, %174 : vector<8x32xf32>
    %176 = vector.extract_strided_slice %13 {offsets = [40, 0], sizes = [8, 32], strides = [1, 1]} : vector<64x32xf32> to vector<8x32xf32>
    %177 = arith.addf %176, %165 : vector<8x32xf32>
    %178 = arith.negf %177 : vector<8x32xf32>
    %179 = math.exp %178 : vector<8x32xf32>
    %cst_60 = arith.constant 1.000000e+00 : f32
    %180 = vector.broadcast %cst_60 : f32 to vector<8x32xf32>
    %181 = arith.addf %180, %179 : vector<8x32xf32>
    %182 = arith.divf %180, %181 : vector<8x32xf32>
    %183 = vector.extract_strided_slice %18 {offsets = [40, 0], sizes = [8, 32], strides = [1, 1]} : vector<64x32xf32> to vector<8x32xf32>
    %184 = arith.mulf %175, %168 : vector<8x32xf32>
    %185 = arith.addf %183, %184 : vector<8x32xf32>
    %186 = math.tanh %185 : vector<8x32xf32>
    %187 = arith.mulf %182, %163 : vector<8x32xf32>
    %cst_61 = arith.constant 1.000000e+00 : f32
    %188 = vector.broadcast %cst_61 : f32 to vector<8x32xf32>
    %189 = arith.subf %188, %182 : vector<8x32xf32>
    %190 = arith.mulf %189, %186 : vector<8x32xf32>
    %191 = arith.addf %187, %190 : vector<8x32xf32>
    %cst_62 = arith.constant dense<0.000000e+00> : vector<8x32xf32>
    %192 = tpu.matmul %191, %19, %cst_62 {dimension_numbers = #tpu.dot_dimension_numbers<[1], [0], [0], [1], [0, 0, 1, 1], [], []>} : vector<8x32xf32>, vector<32x32xf32>, vector<8x32xf32> -> vector<8x32xf32>
    %cst_63 = arith.constant dense<0.000000e+00> : vector<8x32xf32>
    %193 = tpu.matmul %191, %20, %cst_63 {dimension_numbers = #tpu.dot_dimension_numbers<[1], [0], [0], [1], [0, 0, 1, 1], [], []>} : vector<8x32xf32>, vector<32x32xf32>, vector<8x32xf32> -> vector<8x32xf32>
    %cst_64 = arith.constant dense<0.000000e+00> : vector<8x32xf32>
    %194 = tpu.matmul %191, %21, %cst_64 {dimension_numbers = #tpu.dot_dimension_numbers<[1], [0], [0], [1], [0, 0, 1, 1], [], []>} : vector<8x32xf32>, vector<32x32xf32>, vector<8x32xf32> -> vector<8x32xf32>
    %195 = vector.broadcast %22 : vector<1x32xf32> to vector<8x32xf32>
    %196 = arith.addf %194, %195 : vector<8x32xf32>
    %197 = vector.extract_strided_slice %8 {offsets = [48, 0], sizes = [8, 32], strides = [1, 1]} : vector<64x32xf32> to vector<8x32xf32>
    %198 = arith.addf %197, %192 : vector<8x32xf32>
    %199 = arith.negf %198 : vector<8x32xf32>
    %200 = math.exp %199 : vector<8x32xf32>
    %cst_65 = arith.constant 1.000000e+00 : f32
    %201 = vector.broadcast %cst_65 : f32 to vector<8x32xf32>
    %202 = arith.addf %201, %200 : vector<8x32xf32>
    %203 = arith.divf %201, %202 : vector<8x32xf32>
    %204 = vector.extract_strided_slice %13 {offsets = [48, 0], sizes = [8, 32], strides = [1, 1]} : vector<64x32xf32> to vector<8x32xf32>
    %205 = arith.addf %204, %193 : vector<8x32xf32>
    %206 = arith.negf %205 : vector<8x32xf32>
    %207 = math.exp %206 : vector<8x32xf32>
    %cst_66 = arith.constant 1.000000e+00 : f32
    %208 = vector.broadcast %cst_66 : f32 to vector<8x32xf32>
    %209 = arith.addf %208, %207 : vector<8x32xf32>
    %210 = arith.divf %208, %209 : vector<8x32xf32>
    %211 = vector.extract_strided_slice %18 {offsets = [48, 0], sizes = [8, 32], strides = [1, 1]} : vector<64x32xf32> to vector<8x32xf32>
    %212 = arith.mulf %203, %196 : vector<8x32xf32>
    %213 = arith.addf %211, %212 : vector<8x32xf32>
    %214 = math.tanh %213 : vector<8x32xf32>
    %215 = arith.mulf %210, %191 : vector<8x32xf32>
    %cst_67 = arith.constant 1.000000e+00 : f32
    %216 = vector.broadcast %cst_67 : f32 to vector<8x32xf32>
    %217 = arith.subf %216, %210 : vector<8x32xf32>
    %218 = arith.mulf %217, %214 : vector<8x32xf32>
    %219 = arith.addf %215, %218 : vector<8x32xf32>
    %cst_68 = arith.constant dense<0.000000e+00> : vector<8x32xf32>
    %220 = tpu.matmul %219, %19, %cst_68 {dimension_numbers = #tpu.dot_dimension_numbers<[1], [0], [0], [1], [0, 0, 1, 1], [], []>} : vector<8x32xf32>, vector<32x32xf32>, vector<8x32xf32> -> vector<8x32xf32>
    %cst_69 = arith.constant dense<0.000000e+00> : vector<8x32xf32>
    %221 = tpu.matmul %219, %20, %cst_69 {dimension_numbers = #tpu.dot_dimension_numbers<[1], [0], [0], [1], [0, 0, 1, 1], [], []>} : vector<8x32xf32>, vector<32x32xf32>, vector<8x32xf32> -> vector<8x32xf32>
    %cst_70 = arith.constant dense<0.000000e+00> : vector<8x32xf32>
    %222 = tpu.matmul %219, %21, %cst_70 {dimension_numbers = #tpu.dot_dimension_numbers<[1], [0], [0], [1], [0, 0, 1, 1], [], []>} : vector<8x32xf32>, vector<32x32xf32>, vector<8x32xf32> -> vector<8x32xf32>
    %223 = vector.broadcast %22 : vector<1x32xf32> to vector<8x32xf32>
    %224 = arith.addf %222, %223 : vector<8x32xf32>
    %225 = vector.extract_strided_slice %8 {offsets = [56, 0], sizes = [8, 32], strides = [1, 1]} : vector<64x32xf32> to vector<8x32xf32>
    %226 = arith.addf %225, %220 : vector<8x32xf32>
    %227 = arith.negf %226 : vector<8x32xf32>
    %228 = math.exp %227 : vector<8x32xf32>
    %cst_71 = arith.constant 1.000000e+00 : f32
    %229 = vector.broadcast %cst_71 : f32 to vector<8x32xf32>
    %230 = arith.addf %229, %228 : vector<8x32xf32>
    %231 = arith.divf %229, %230 : vector<8x32xf32>
    %232 = vector.extract_strided_slice %13 {offsets = [56, 0], sizes = [8, 32], strides = [1, 1]} : vector<64x32xf32> to vector<8x32xf32>
    %233 = arith.addf %232, %221 : vector<8x32xf32>
    %234 = arith.negf %233 : vector<8x32xf32>
    %235 = math.exp %234 : vector<8x32xf32>
    %cst_72 = arith.constant 1.000000e+00 : f32
    %236 = vector.broadcast %cst_72 : f32 to vector<8x32xf32>
    %237 = arith.addf %236, %235 : vector<8x32xf32>
    %238 = arith.divf %236, %237 : vector<8x32xf32>
    %239 = vector.extract_strided_slice %18 {offsets = [56, 0], sizes = [8, 32], strides = [1, 1]} : vector<64x32xf32> to vector<8x32xf32>
    %240 = arith.mulf %231, %224 : vector<8x32xf32>
    %241 = arith.addf %239, %240 : vector<8x32xf32>
    %242 = math.tanh %241 : vector<8x32xf32>
    %243 = arith.mulf %238, %219 : vector<8x32xf32>
    %cst_73 = arith.constant 1.000000e+00 : f32
    %244 = vector.broadcast %cst_73 : f32 to vector<8x32xf32>
    %245 = arith.subf %244, %238 : vector<8x32xf32>
    %246 = arith.mulf %245, %242 : vector<8x32xf32>
    %247 = arith.addf %243, %246 : vector<8x32xf32>
    %c0_74 = arith.constant 0 : index
    %c0_75 = arith.constant 0 : index
    %248 = vector.load %arg16[%c0_74, %c0_75] : memref<8x32xf32, #tpu.memory_space<vmem>>, vector<8x32xf32>
    tpu.vector_store %arg16[%c0_74, %c0_75], %247 {strides = array<i32>} : memref<8x32xf32, #tpu.memory_space<vmem>>, vector<8x32xf32>,
    %249 = tpu.concatenate %51, %79, %107, %135, %163, %191, %219, %247 in 0 : vector<8x32xf32>, vector<8x32xf32>, vector<8x32xf32>, vector<8x32xf32>, vector<8x32xf32>, vector<8x32xf32>, vector<8x32xf32>, vector<8x32xf32> -> vector<64x32xf32>
    %c0_76 = arith.constant 0 : index
    %c0_77 = arith.constant 0 : index
    %250 = vector.load %arg15[%c0_76, %c0_77] : memref<64x32xf32, #tpu.memory_space<vmem>>, vector<64x32xf32>
    tpu.vector_store %arg15[%c0_76, %c0_77], %249 {strides = array<i32>} : memref<64x32xf32, #tpu.memory_space<vmem>>, vector<64x32xf32>,
    %c0_78 = arith.constant 0 : index
    %c0_79 = arith.constant 0 : index
    %251 = vector.load %arg12[%c0_78, %c0_79] : memref<32x8xf32, #tpu.memory_space<vmem>>, vector<32x8xf32>
    %cst_80 = arith.constant dense<0.000000e+00> : vector<64x8xf32>
    %252 = tpu.matmul %249, %251, %cst_80 {dimension_numbers = #tpu.dot_dimension_numbers<[1], [0], [0], [1], [0, 0, 1, 1], [], []>} : vector<64x32xf32>, vector<32x8xf32>, vector<64x8xf32> -> vector<64x8xf32>
    %c0_81 = arith.constant 0 : index
    %c0_82 = arith.constant 0 : index
    %253 = vector.load %arg13[%c0_81, %c0_82] : memref<1x8xf32, #tpu.memory_space<vmem>>, vector<1x8xf32>
    %254 = vector.broadcast %253 : vector<1x8xf32> to vector<64x8xf32>
    %255 = arith.addf %252, %254 : vector<64x8xf32>
    %c0_83 = arith.constant 0 : index
    %c0_84 = arith.constant 0 : index
    %256 = vector.load %arg14[%c0_83, %c0_84] : memref<64x8xf32, #tpu.memory_space<vmem>>, vector<64x8xf32>
    tpu.vector_store %arg14[%c0_83, %c0_84], %255 {strides = array<i32>} : memref<64x8xf32, #tpu.memory_space<vmem>>, vector<64x8xf32>,
    return
  }
  func.func @transform_0(%arg0: i32) -> (i32, i32) {
    %c0_i32 = arith.constant 0 : i32
    %c0_i32_0 = arith.constant 0 : i32
    return %arg0, %c0_i32 : i32, i32
  }
  func.func @transform_1(%arg0: i32) -> (i32, i32) {
    %c0_i32 = arith.constant 0 : i32
    %c0_i32_0 = arith.constant 0 : i32
    %c0_i32_1 = arith.constant 0 : i32
    return %c0_i32, %c0_i32_0 : i32, i32
  }
  func.func @transform_2(%arg0: i32) -> (i32, i32) {
    %c0_i32 = arith.constant 0 : i32
    %c0_i32_0 = arith.constant 0 : i32
    %c0_i32_1 = arith.constant 0 : i32
    return %c0_i32, %c0_i32_0 : i32, i32
  }
  func.func @transform_3(%arg0: i32) -> (i32, i32) {
    %c0_i32 = arith.constant 0 : i32
    %c0_i32_0 = arith.constant 0 : i32
    %c0_i32_1 = arith.constant 0 : i32
    return %c0_i32, %c0_i32_0 : i32, i32
  }
  func.func @transform_4(%arg0: i32) -> (i32, i32) {
    %c0_i32 = arith.constant 0 : i32
    %c0_i32_0 = arith.constant 0 : i32
    %c0_i32_1 = arith.constant 0 : i32
    return %c0_i32, %c0_i32_0 : i32, i32
  }
  func.func @transform_5(%arg0: i32) -> (i32, i32) {
    %c0_i32 = arith.constant 0 : i32
    %c0_i32_0 = arith.constant 0 : i32
    %c0_i32_1 = arith.constant 0 : i32
    return %c0_i32, %c0_i32_0 : i32, i32
  }
  func.func @transform_6(%arg0: i32) -> (i32, i32) {
    %c0_i32 = arith.constant 0 : i32
    %c0_i32_0 = arith.constant 0 : i32
    %c0_i32_1 = arith.constant 0 : i32
    return %c0_i32, %c0_i32_0 : i32, i32
  }
  func.func @transform_7(%arg0: i32) -> (i32, i32) {
    %c0_i32 = arith.constant 0 : i32
    %c0_i32_0 = arith.constant 0 : i32
    %c0_i32_1 = arith.constant 0 : i32
    return %c0_i32, %c0_i32_0 : i32, i32
  }
  func.func @transform_8(%arg0: i32) -> (i32, i32) {
    %c0_i32 = arith.constant 0 : i32
    %c0_i32_0 = arith.constant 0 : i32
    %c0_i32_1 = arith.constant 0 : i32
    return %c0_i32, %c0_i32_0 : i32, i32
  }
  func.func @transform_9(%arg0: i32) -> (i32, i32) {
    %c0_i32 = arith.constant 0 : i32
    %c0_i32_0 = arith.constant 0 : i32
    %c0_i32_1 = arith.constant 0 : i32
    return %c0_i32, %c0_i32_0 : i32, i32
  }
  func.func @transform_10(%arg0: i32) -> (i32, i32) {
    %c0_i32 = arith.constant 0 : i32
    %c0_i32_0 = arith.constant 0 : i32
    %c0_i32_1 = arith.constant 0 : i32
    return %c0_i32, %c0_i32_0 : i32, i32
  }
  func.func @transform_11(%arg0: i32) -> (i32, i32) {
    %c0_i32 = arith.constant 0 : i32
    %c0_i32_0 = arith.constant 0 : i32
    %c0_i32_1 = arith.constant 0 : i32
    return %c0_i32, %c0_i32_0 : i32, i32
  }
  func.func @transform_12(%arg0: i32) -> (i32, i32) {
    %c0_i32 = arith.constant 0 : i32
    %c0_i32_0 = arith.constant 0 : i32
    %c0_i32_1 = arith.constant 0 : i32
    return %c0_i32, %c0_i32_0 : i32, i32
  }
  func.func @transform_13(%arg0: i32) -> (i32, i32) {
    %c0_i32 = arith.constant 0 : i32
    %c0_i32_0 = arith.constant 0 : i32
    return %arg0, %c0_i32 : i32, i32
  }
  func.func @transform_14(%arg0: i32) -> (i32, i32) {
    %c0_i32 = arith.constant 0 : i32
    %c0_i32_0 = arith.constant 0 : i32
    return %arg0, %c0_i32 : i32, i32
  }
}

</mosaic_0001>

<bundles_post_ra>
// kernel: tpu_custom_call.1
= control target key start
LH: loop header
LB: loop body
LE: loop exit
PB: predicated region body
PF: predicated region fallthrough
CT: control target
= control target key end

     0   :  { %20 = vsyncpa [#allocation4], 0  ;;  %s3327_s29 = smov [#allocation3]   ;;  %s3933_s0 = inlined_call_operand.vmem [shape: f32[64,16], index: 0, kind: input, shape index: {}]   ;;  %s3934_s1 = inlined_call_operand.vmem [shape: f32[16,32], index: 1, kind: input, shape index: {}]   ;;  %s3935_s2 = inlined_call_operand.hbm [shape: f32[16,32], index: 2, kind: input, shape index: {}]   ;;  %s3936_s3 = inlined_call_operand.vmem [shape: f32[16,32], index: 3, kind: input, shape index: {}]   ;;  %s3937_s4 = inlined_call_operand.vmem [shape: f32[32,32], index: 4, kind: input, shape index: {}]   ;;  %s3938_s5 = inlined_call_operand.vmem [shape: f32[32,32], index: 5, kind: input, shape index: {}]   ;;  %s3939_s6 = inlined_call_operand.vmem [shape: f32[32,32], index: 6, kind: input, shape index: {}]   ;;  %s3940_s7 = inlined_call_operand.vmem [shape: f32[1,32], index: 7, kind: input, shape index: {}]   ;;  %s3941_s8 = inlined_call_operand.vmem [shape: f32[1,32], index: 8, kind: input, shape index: {}]   ;;  %s3942_s9 = inlined_call_operand.vmem [shape: f32[1,32], index: 9, kind: input, shape index: {}]   ;;  %s3943_s10 = inlined_call_operand.vmem [shape: f32[1,32], index: 10, kind: input, shape index: {}]   ;;  %s3944_s11 = inlined_call_operand.vmem [shape: f32[32,8], index: 11, kind: input, shape index: {}]   ;;  %s3945_s12 = inlined_call_operand.vmem [shape: f32[1,8], index: 12, kind: input, shape index: {}]   ;;  %s3946_s13 = inlined_call_operand.vmem [shape: f32[64,8], index: 13, kind: output, shape index: {0}]   ;;  %s3947_s14 = inlined_call_operand.vmem [shape: f32[64,32], index: 14, kind: output, shape index: {1}]  }
   0x1   :  { %s30_s30 = sshll.u32 %s3327_s29, 4  ;;  %s3303_s17 = scalar_lea.hbm %s3935_s2, 256  ;;  %s31_s30 = int_to_ptr.vmem [resolvable:$true] %s30_s30 }
   0x2   :  { %p3304_p0 = scmp.ne.s32.totalorder %s3935_s2, %s3303_s17  ;;  %p3307_p1 = scmp.lt.u32.totalorder %s3303_s17, %s3935_s2 }
   0x4   :  { %p3309_p2 = pnand %p3307_p1, %p3304_p0 }
   0x6   :  { %3312 = shalt.err (!%p3309_p2)
}
   0x7   :  { %s3313_s22 = scalar_lea.vmem %s31_s30, 256  ;;  %p3318_p4 = scmp.lt.s32.totalorder %s31_s30, %s31_s30 }
   0x8   :  { %p3314_p3 = scmp.ne.s32.totalorder %s31_s30, %s3313_s22  ;;  %p3319_p5 = scmp.lt.s32.totalorder %s3313_s22, %s3313_s22 }
   0xa   :  { %p3320_p6 = por %p3319_p5, %p3318_p4 }
   0xc   :  { %p3321_p7 = pnand %p3320_p6, %p3314_p3 }
   0xe   :  { %3324 = shalt.err (!%p3321_p7)
}
   0xf   :  { %s3328_s23 = smov 128   ;;  %s3329_s24 = smov 8  }
  0x10   :  { %36 = dma.hbm_to_vmem [thread:$0]  %s3935_s2, 256, %s31_s30, [#allocation4], %s3328_s23, %s3328_s23, %s3329_s24  }
  0x11   :  { %3325 = dma.done.wait [#allocation4], 256  }
  0x12   :  { %3326 = vsyncadd [#allocation4], 4294967040  ;;  %vm64_vm0 = vcmask 261120   ;;  %v3330_v0 = vmov 0.0   ;;  %vm83_vm1 = vcmask 130048   ;;  %v74_v1 = vld [vmem:[%s3934_s1] sm:$0xff] }
  0x13   :  { %65 = vst.msk [vmem:[#allocation2] sm:$0xff] %vm64_vm0, %v3330_v0  ;;  %v75_v2 = vld [vmem:[%s3934_s1 + $0x8] sm:$0xff]  ;;  %v68_v3 = vld [vmem:[%s3933_s0 + $0x10] sm:$0xff]  ;;  %v69_v8 = vld [vmem:[%s3933_s0 + $0x18] sm:$0xff]  ;;  %v3331_v19 = vmov 0.0|0.0   ;;  %vm3332_vm2 = vmmov 0  }
  0x14   :  { %v3051_v4 = vpack.c.bf16 %v75_v2, %v74_v1  ;;  %2726 = vmatprep.mubr.msk.f32.mxu1 %vm83_vm1, %v68_v3  ;;  %v213_v5 = vld [vmem:[#allocation3] sm:$0xff]  ;;  %v214_v6 = vld [vmem:[#allocation3 + $0x8] sm:$0xff]  ;;  %v66_v9 = vld [vmem:[%s3933_s0] sm:$0xff]  ;;  %vm2462_vm3 = vcmask 64512  }
  0x15   :  { %v3055_v7 = vpack.c.bf16 %v214_v6, %v213_v5  ;;  %v70_v10 = vld [vmem:[%s3933_s0 + $0x20] sm:$0xff]  ;;  %2723 = vmatprep.mubr.msk.f32.mxu0 %vm83_vm1, %v66_v9  ;;  %v67_v11 = vld [vmem:[%s3933_s0 + $0x8] sm:$0xff]  ;;  %v72_v18 = vld [vmem:[%s3933_s0 + $0x30] sm:$0xff] }
  0x16   :  { %3215 = vmatprep.subr.bf16.mxu1 %v3051_v4  ;;  %3052 = vmatprep.subr.bf16.mxu0 %v3051_v4  ;;  %v327_v12 = vld [vmem:[%s3936_s3] sm:$0xff]  ;;  %v328_v13 = vld [vmem:[%s3936_s3 + $0x8] sm:$0xff]  ;;  %v73_v21 = vld [vmem:[%s3933_s0 + $0x38] sm:$0xff] }
  0x17   :  { %3216 = vmatpush3.bf16.msra.mxu1 %v3051_v4  ;;  %3054 = vmatpush3.bf16.msra.mxu0 %v3051_v4  ;;  %v71_v14 = vld [vmem:[%s3933_s0 + $0x28] sm:$0xff]  ;;  %v3059_v15 = vpack.c.bf16 %v328_v13, %v327_v12  ;;  %v449_v16 = vld [vmem:[%s3939_s6] sm:$0xff]  ;;  %v451_v24 = vld [vmem:[%s3939_s6 + $0x10] sm:$0xff] }
  0x18   :  { %3056 = vmatprep.subr.bf16.mxu1 %v3055_v7  ;;  %v450_v17 = vld [vmem:[%s3939_s6 + $0x8] sm:$0xff]  ;;  %v441_v22 = vld [vmem:[%s3937_s4] sm:$0xff]  ;;  %v452_v25 = vld [vmem:[%s3939_s6 + $0x18] sm:$0xff] }
  0x19   :  { %3060 = vmatprep.subr.bf16.mxu0 %v3059_v15  ;;  %v3469_v20 = vpack.c.bf16 %v450_v17, %v449_v16  ;;  %v442_v23 = vld [vmem:[%s3937_s4 + $0x8] sm:$0xff]  ;;  %v443_v27 = vld [vmem:[%s3937_s4 + $0x10] sm:$0xff]  ;;  %v444_v28 = vld [vmem:[%s3937_s4 + $0x18] sm:$0xff]  ;;  %v3502_v29 = vpack.c.bf16 %v452_v25, %v451_v24 }
  0x1a   :  { %2727 = vmatmul.mubr.msk.f32.vlgmr.msra.gmra.mrb[0].mxu1 %vm83_vm1, %v69_v8  ;;  %2724 = vmatmul.mubr.msk.f32.vlgmr.msra.gmra.mrb[0].mxu0 %vm83_vm1, %v67_v11  ;;  %v3492_v26 = vpack.c.bf16 %v442_v23, %v441_v22  ;;  %v3509_v30 = vpack.c.bf16 %v444_v28, %v443_v27  ;;  %v445_v31 = vld [vmem:[%s3938_s5] sm:$0xff]  ;;  %v446_v32 = vld [vmem:[%s3938_s5 + $0x8] sm:$0xff]  ;;  %v447_v35 = vld [vmem:[%s3938_s5 + $0x10] sm:$0xff] }
  0x1b   :  { %3058 = vmatpush3.bf16.msra.mxu1 %v3055_v7  ;;  %2729 = vmatprep.mubr.msk.f32.mxu1 %vm83_vm1, %v70_v10  ;;  %v3531_v33 = vld [vmem:[#allocation2] sm:$0xff]  ;;  %v3533_v34 = vpack.c.bf16 %v446_v32, %v445_v31  ;;  %v448_v36 = vld [vmem:[%s3938_s5 + $0x18] sm:$0xff] }
  0x1c   :  { %3063 = vmatprep.subr.bf16.mxu1 %v3331_v19  ;;  %2755 = vmatprep.mubr.msk.f32.mxu0 %vm83_vm1, %v66_v9  ;;  %v3548_v37 = vpack.c.bf16 %v448_v36, %v447_v35  ;;  %v2480_v38 = vld [vmem:[%s3940_s7] ss:$0 sm:$0xff] }
  0x1d   :  { %3062 = vmatpush3.bf16.msra.mxu0 %v3059_v15  ;;  %v2498_v49 = vld [vmem:[%s3942_s9] ss:$0 sm:$0xff] }
  0x1e   :  { %2730 = vmatmul.mubr.msk.f32.gmra.mrb[2].mxu1 %vm83_vm1, %v71_v14  ;;  %3075 = vmatprep.subr.bf16.mxu0 %v3331_v19  ;;  %v2489_v58 = vld [vmem:[%s3941_s8] ss:$0 sm:$0xff] }
  0x1f   :  { %2732 = vmatprep.mubr.msk.f32.mxu1 %vm83_vm1, %v72_v18 }
  0x20   :  { %2756 = vmatmul.mubr.msk.f32.vlgmr.msra.gmra.mrb[2].mxu0 %vm83_vm1, %v67_v11 }
  0x21   :  { %3077 = vmatpush3.bf16.msra.mxu0 %v3469_v20  ;;  %2758 = vmatprep.mubr.msk.f32.mxu0 %vm83_vm1, %v68_v3 }
  0x22   :  { %2733 = vmatmul.mubr.msk.f32.gmra.mrb[4].mxu1 %vm83_vm1, %v73_v21  ;;  %3078 = vmatprep.subr.bf16.mxu0 %v3331_v19 }
  0x23   :  { %2739 = vmatprep.mubr.msk.f32.mxu1 %vm83_vm1, %v66_v9 }
  0x24   :  { %2759 = vmatmul.mubr.msk.f32.gmra.mrb[4].mxu0 %vm83_vm1, %v69_v8 }
  0x25   :  { %2761 = vmatprep.mubr.msk.f32.mxu0 %vm83_vm1, %v70_v10  ;;  %3080 = vmatpush3.bf16.msra.mxu0 %v3502_v29 }
  0x26   :  { %2740 = vmatmul.mubr.msk.f32.vlgmr.msra.gmra.mrb[6].mxu1 %vm83_vm1, %v67_v11  ;;  %3087 = vmatprep.subr.bf16.mxu0 %v3331_v19 }
  0x27   :  { %3065 = vmatpush3.bf16.msra.mxu1 %v3492_v26  ;;  %2742 = vmatprep.mubr.msk.f32.mxu1 %vm83_vm1, %v68_v3 }
  0x28   :  { %3066 = vmatprep.subr.bf16.mxu1 %v3331_v19  ;;  %2762 = vmatmul.mubr.msk.f32.gmra.mrb[6].mxu0 %vm83_vm1, %v71_v14 }
  0x29   :  { %2764 = vmatprep.mubr.msk.f32.mxu0 %vm83_vm1, %v72_v18 }
  0x2a   :  { %2743 = vmatmul.mubr.msk.f32.gmra.mrb[8].mxu1 %vm83_vm1, %v69_v8 }
  0x2b   :  { %2745 = vmatprep.mubr.msk.f32.mxu1 %vm83_vm1, %v70_v10  ;;  %3068 = vmatpush3.bf16.msra.mxu1 %v3509_v30 }
  0x2c   :  { %3069 = vmatprep.subr.bf16.mxu1 %v3331_v19  ;;  %2765 = vmatmul.mubr.msk.f32.gmra.mrb[8].mxu0 %vm83_vm1, %v73_v21 }
  0x2d   :  { %2797 = vmatprep.mubr.msk.f32.mxu0 %vm3332_vm2, %v3330_v0 }
  0x2e   :  { %2746 = vmatmul.mubr.msk.f32.gmra.mrb[10].mxu1 %vm83_vm1, %v71_v14 }
  0x2f   :  { %2748 = vmatprep.mubr.msk.f32.mxu1 %vm83_vm1, %v72_v18 }
  0x30   :  { %2798 = vmatmul.mubr.msk.f32.vlgmr.msra.gmra.mrb[10].mxu0 %vm64_vm0, %v3531_v33 }
  0x31   :  { %3089 = vmatpush3.bf16.msra.mxu0 %v3533_v34  ;;  %2819 = vmatprep.mubr.msk.f32.mxu0 %vm3332_vm2, %v3330_v0 }
  0x32   :  { %2749 = vmatmul.mubr.msk.f32.gmra.mrb[12].mxu1 %vm83_vm1, %v73_v21  ;;  %3090 = vmatprep.subr.bf16.mxu0 %v3331_v19 }
  0x33   :  { %2775 = vmatprep.mubr.msk.f32.mxu1 %vm3332_vm2, %v3330_v0 }
  0x35   :  { %3092 = vmatpush3.bf16.msra.mxu0 %v3548_v37 }
  0x36   :  { %2776 = vmatmul.mubr.msk.f32.vlgmr.msra.gmra.mrb[14].mxu1 %vm64_vm0, %v3531_v33  ;;  %3099 = vmatprep.subr.bf16.mxu0 %v3331_v19 }
  0x37   :  { %3071 = vmatpush3.bf16.msra.mxu1 %v3533_v34  ;;  %2786 = vmatprep.mubr.msk.f32.mxu1 %vm3332_vm2, %v3330_v0 }
  0x38   :  { %3072 = vmatprep.subr.bf16.mxu1 %v3331_v19 }
  0x3b   :  { %3074 = vmatpush3.bf16.msra.mxu1 %v3548_v37 }
  0x3c   :  { %3081 = vmatprep.subr.bf16.mxu1 %v3331_v19 }
  0x3e   :  { %2787 = vmatmul.mubr.msk.f32.vlgmr.msra.gmra.mrb[16].mxu1 %vm64_vm0, %v3531_v33 }
  0x3f   :  { %3083 = vmatpush3.bf16.msra.mxu1 %v3492_v26  ;;  %2808 = vmatprep.mubr.msk.f32.mxu1 %vm3332_vm2, %v3330_v0 }
  0x40   :  { %3084 = vmatprep.subr.bf16.mxu1 %v3331_v19 }
  0x43   :  { %3086 = vmatpush3.bf16.msra.mxu1 %v3509_v30 }
  0x44   :  { %3093 = vmatprep.subr.bf16.mxu1 %v3331_v19 }
  0xed   :  { %v2728_v39 = vpop.f32.mrb[0].mxu1  ;;  %v2725_v40 = vpop.f32.mrb[0].mxu0 }
  0xee   :  { %v3573_v41 = vadd.f32 %v2728_v39, %v2480_v38  ;;  %v184_v42 = vpop.f32.mrb[1].mxu1  ;;  %v3575_v43 = vadd.f32 %v2725_v40, %v2480_v38  ;;  %v174_v44 = vpop.f32.mrb[1].mxu0 }
  0xef   :  { %v3577_v45 = vadd.f32 %v2480_v38, %v184_v42  ;;  %v175_v27 = vadd.f32 %v2480_v38, %v174_v44 }
  0xf1   :  { %v2731_v46 = vpop.f32.mrb[2].mxu1 }
  0xf2   :  { %v3579_v47 = vadd.f32 %v2731_v46, %v2480_v38  ;;  %v194_v48 = vpop.f32.mrb[3].mxu1 }
  0xf3   :  { %v3584_v50 = vadd.f32 %v2480_v38, %v194_v48  ;;  %v2757_v51 = vpop.f32.mrb[2].mxu0 }
  0xf4   :  { %v3586_v53 = vadd.f32 %v2757_v51, %v2498_v49  ;;  %v402_v54 = vpop.f32.mrb[3].mxu0 }
  0xf5   :  { %v2734_v52 = vpop.f32.mrb[4].mxu1 }
  0xf6   :  { %v3588_v55 = vadd.f32 %v2734_v52, %v2480_v38  ;;  %v204_v56 = vpop.f32.mrb[5].mxu1 }
  0xf7   :  { %v3590_v57 = vadd.f32 %v2480_v38, %v204_v56  ;;  %v2760_v59 = vpop.f32.mrb[4].mxu0  ;;  %v3624_v38 = vld [vmem:[%s3943_s10] ss:$0 sm:$0xff] }
  0xf8   :  { %v3595_v61 = vadd.f32 %v2760_v59, %v2498_v49  ;;  %v412_v62 = vpop.f32.mrb[5].mxu0 }
  0xf9   :  { %v2741_v60 = vpop.f32.mrb[6].mxu1  ;;  %v3599_v2 = vadd.f32 %v2498_v49, %v412_v62 }
  0xfa   :  { %v3597_v63 = vadd.f32 %v2741_v60, %v2489_v58  ;;  %v288_v1 = vpop.f32.mrb[7].mxu1 }
  0xfb   :  { %v2763_v3 = vpop.f32.mrb[6].mxu0  ;;  %v289_v39 = vadd.f32 %v2489_v58, %v288_v1 }
  0xfc   :  { %v3601_v5 = vadd.f32 %v2763_v3, %v2498_v49  ;;  %v422_v6 = vpop.f32.mrb[7].mxu0 }
  0xfd   :  { %v2744_v4 = vpop.f32.mrb[8].mxu1  ;;  %v3605_v9 = vadd.f32 %v2498_v49, %v422_v6 }
  0xfe   :  { %v3603_v7 = vadd.f32 %v2744_v4, %v2489_v58  ;;  %v298_v8 = vpop.f32.mrb[9].mxu1 }
  0xff   :  { %v3607_v10 = vadd.f32 %v2489_v58, %v298_v8  ;;  %v2766_v11 = vpop.f32.mrb[8].mxu0 }
 0x100   :  { %v3609_v13 = vadd.f32 %v2766_v11, %v2498_v49  ;;  %v432_v14 = vpop.f32.mrb[9].mxu0 }
 0x101   :  { %v2747_v12 = vpop.f32.mrb[10].mxu1  ;;  %v3613_v17 = vadd.f32 %v2498_v49, %v432_v14 }
 0x102   :  { %v3611_v15 = vadd.f32 %v2747_v12, %v2489_v58  ;;  %v308_v16 = vpop.f32.mrb[11].mxu1 }
 0x103   :  { %v3615_v18 = vadd.f32 %v2489_v58, %v308_v16  ;;  %v671_v21 = vpop.f32.mrb[10].mxu0 }
 0x104   :  { %v2799_v23 = vpop.f32.mrb[11].mxu0  ;;  %v672_v59 = vadd.f32 %v3624_v38, %v671_v21 }
 0x105   :  { %v2750_v22 = vpop.f32.mrb[12].mxu1 }
 0x106   :  { %v3617_v24 = vadd.f32 %v2750_v22, %v2489_v58  ;;  %v318_v25 = vpop.f32.mrb[13].mxu1 }
 0x107   :  { %v3619_v28 = vadd.f32 %v2489_v58, %v318_v25  ;;  %v403_v58 = vadd.f32 %v2498_v49, %v402_v54 }
 0x109   :  { %v525_v31 = vpop.f32.mrb[14].mxu1 }
 0x10a   :  { %v675_v32 = vadd.f32 %v525_v31, %v175_v27  ;;  %v2777_v35 = vpop.f32.mrb[15].mxu1 }
 0x10c   :  { %v2511_v36 = vmul.f32 -1.442695, %v675_v32 }
 0x10e   :  { %3223 = vpow2.f32 %v2511_v36 }
 0x111   :  { %v595_v40 = vpop.f32.mrb[16].mxu1 }
 0x112   :  { %v682_v42 = vadd.f32 %v595_v40, %v289_v39  ;;  %v2788_v46 = vpop.f32.mrb[17].mxu1 }
 0x114   :  { %v2512_v48 = vmul.f32 -1.442695, %v682_v42 }
 0x116   :  { %3225 = vpow2.f32 %v2512_v48 }
 0x118   :  { %v3224_v51 = vpop.eup %3223 }
 0x119   :  { %v679_v52 = vadd.f32 1.0, %v3224_v51 }
 0x11b   :  { %3227 = vrcp.f32 %v679_v52 }
 0x120   :  { %v3226_v44 = vpop.eup %3225 }
 0x121   :  { %v686_v56 = vadd.f32 1.0, %v3226_v44 }
 0x123   :  { %3229 = vrcp.f32 %v686_v56 }
 0x125   :  { %v3228_v60 = vpop.eup %3227 }
 0x126   :  { %v689_v62 = vmul.f32 %v3228_v60, %v672_v59 }
 0x128   :  { %v690_v1 = vadd.f32 %v689_v62, %v403_v58 }
 0x12a   :  { %3231 = vtanh.f32 %v690_v1 }
 0x12d   :  { %v3230_v3 = vpop.eup %3229 }
 0x12e   :  { %v693_v4 = vsub.f32 1.0, %v3230_v3  ;;  %v692_v8 = vmul.f32 %v3230_v3, %v3531_v33 }
 0x134   :  { %v3232_v6 = vpop.eup %3231 }
 0x135   :  { %v694_v11 = vmul.f32 %v3232_v6, %v693_v4 }
 0x137   :  { %v3628_v12 = vadd.f32 %v694_v11, %v692_v8 }
 0x139   :  { %2809 = vmatmul.mubr.msk.f32.vlgmr.msra.gmra.mrb[18].mxu1 %vm64_vm0, %v3628_v12  ;;  %2335 = vst.msk [vmem:[%s3947_s14] sm:$0xff] %vm64_vm0, %v3628_v12  ;;  %2820 = vmatmul.mubr.msk.f32.vlgmr.msra.gmra.mrb[12].mxu0 %vm64_vm0, %v3628_v12 }
 0x13a   :  { %3095 = vmatpush3.bf16.msra.mxu1 %v3469_v20  ;;  %2830 = vmatprep.mubr.msk.f32.mxu1 %vm3332_vm2, %v3330_v0 }
 0x13b   :  { %3096 = vmatprep.subr.bf16.mxu1 %v3331_v19  ;;  %3101 = vmatpush3.bf16.msra.mxu0 %v3492_v26 }
 0x13c   :  { %3102 = vmatprep.subr.bf16.mxu0 %v3331_v19  ;;  %2841 = vmatprep.mubr.msk.f32.mxu0 %vm3332_vm2, %v3330_v0 }
 0x13e   :  { %3098 = vmatpush3.bf16.msra.mxu1 %v3502_v29 }
 0x13f   :  { %3105 = vmatprep.subr.bf16.mxu1 %v3331_v19  ;;  %3104 = vmatpush3.bf16.msra.mxu0 %v3509_v30 }
 0x140   :  { %3111 = vmatprep.subr.bf16.mxu0 %v3331_v19 }
 0x141   :  { %2831 = vmatmul.mubr.msk.f32.vlgmr.msra.gmra.mrb[20].mxu1 %vm64_vm0, %v3628_v12 }
 0x142   :  { %3107 = vmatpush3.bf16.msra.mxu1 %v3533_v34  ;;  %2852 = vmatprep.mubr.msk.f32.mxu1 %vm3332_vm2, %v3330_v0 }
 0x143   :  { %3108 = vmatprep.subr.bf16.mxu1 %v3331_v19 }
 0x146   :  { %3110 = vmatpush3.bf16.msra.mxu1 %v3548_v37 }
 0x147   :  { %3117 = vmatprep.subr.bf16.mxu1 %v3331_v19 }
 0x20c   :  { %v765_v33 = vpop.f32.mrb[18].mxu1  ;;  %v835_v49 = vpop.f32.mrb[12].mxu0 }
 0x20d   :  { %v909_v54 = vadd.f32 %v765_v33, %v3575_v43  ;;  %v916_v14 = vadd.f32 %v835_v49, %v3597_v63  ;;  %v2810_v16 = vpop.f32.mrb[19].mxu1  ;;  %v2821_v21 = vpop.f32.mrb[13].mxu0 }
 0x20f   :  { %v2516_v22 = vmul.f32 -1.442695, %v909_v54  ;;  %v2517_v23 = vmul.f32 -1.442695, %v916_v14 }
 0x211   :  { %3233 = vpow2.f32 %v2516_v22 }
 0x212   :  { %3235 = vpow2.f32 %v2517_v23 }
 0x214   :  { %v905_v25 = vpop.f32.mrb[20].mxu1 }
 0x215   :  { %v2832_v27 = vpop.f32.mrb[21].mxu1  ;;  %v906_v39 = vadd.f32 %v3624_v38, %v905_v25 }
 0x21b   :  { %v3234_v31 = vpop.eup %3233 }
 0x21c   :  { %v913_v32 = vadd.f32 1.0, %v3234_v31  ;;  %v3236_v35 = vpop.eup %3235 }
 0x21d   :  { %v920_v36 = vadd.f32 1.0, %v3236_v35 }
 0x21e   :  { %3237 = vrcp.f32 %v913_v32 }
 0x21f   :  { %3239 = vrcp.f32 %v920_v36 }
 0x228   :  { %v3238_v40 = vpop.eup %3237 }
 0x229   :  { %v923_v43 = vmul.f32 %v3238_v40, %v906_v39  ;;  %v3240_v42 = vpop.eup %3239 }
 0x22a   :  { %v927_v46 = vsub.f32 1.0, %v3240_v42  ;;  %v926_v51 = vmul.f32 %v3240_v42, %v3628_v12 }
 0x22b   :  { %v924_v63 = vadd.f32 %v923_v43, %v3586_v53 }
 0x22d   :  { %3241 = vtanh.f32 %v924_v63 }
 0x237   :  { %v3242_v48 = vpop.eup %3241 }
 0x238   :  { %v928_v52 = vmul.f32 %v3242_v48, %v927_v46 }
 0x23a   :  { %v3664_v44 = vadd.f32 %v928_v52, %v926_v51 }
 0x23c   :  { %2842 = vmatmul.mubr.msk.f32.vlgmr.msra.gmra.mrb[14].mxu0 %vm64_vm0, %v3664_v44  ;;  %2336 = vst.msk [vmem:[%s3947_s14 + $0x8] sm:$0xff] %vm64_vm0, %v3664_v44  ;;  %2853 = vmatmul.mubr.msk.f32.vlgmr.msra.gmra.mrb[22].mxu1 %vm64_vm0, %v3664_v44 }
 0x23d   :  { %3113 = vmatpush3.bf16.msra.mxu0 %v3469_v20  ;;  %2863 = vmatprep.mubr.msk.f32.mxu0 %vm3332_vm2, %v3330_v0 }
 0x23e   :  { %3114 = vmatprep.subr.bf16.mxu0 %v3331_v19  ;;  %3119 = vmatpush3.bf16.msra.mxu1 %v3492_v26 }
 0x23f   :  { %3120 = vmatprep.subr.bf16.mxu1 %v3331_v19  ;;  %2874 = vmatprep.mubr.msk.f32.mxu1 %vm3332_vm2, %v3330_v0 }
 0x241   :  { %3116 = vmatpush3.bf16.msra.mxu0 %v3502_v29 }
 0x242   :  { %3123 = vmatprep.subr.bf16.mxu0 %v3331_v19  ;;  %3122 = vmatpush3.bf16.msra.mxu1 %v3509_v30 }
 0x243   :  { %3129 = vmatprep.subr.bf16.mxu1 %v3331_v19 }
 0x244   :  { %2864 = vmatmul.mubr.msk.f32.vlgmr.msra.gmra.mrb[16].mxu0 %vm64_vm0, %v3664_v44 }
 0x245   :  { %3125 = vmatpush3.bf16.msra.mxu0 %v3533_v34  ;;  %2885 = vmatprep.mubr.msk.f32.mxu0 %vm3332_vm2, %v3330_v0 }
 0x246   :  { %3126 = vmatprep.subr.bf16.mxu0 %v3331_v19 }
 0x249   :  { %3128 = vmatpush3.bf16.msra.mxu0 %v3548_v37 }
 0x24a   :  { %3135 = vmatprep.subr.bf16.mxu0 %v3331_v19 }
 0x30f   :  { %v999_v53 = vpop.f32.mrb[14].mxu0  ;;  %v1069_v56 = vpop.f32.mrb[22].mxu1 }
 0x310   :  { %v1143_v59 = vadd.f32 %v999_v53, %v3577_v45  ;;  %v1150_v60 = vadd.f32 %v1069_v56, %v3607_v10  ;;  %v2843_v58 = vpop.f32.mrb[15].mxu0  ;;  %v2854_v62 = vpop.f32.mrb[23].mxu1 }
 0x312   :  { %v2521_v1 = vmul.f32 -1.442695, %v1143_v59  ;;  %v2522_v3 = vmul.f32 -1.442695, %v1150_v60 }
 0x314   :  { %3243 = vpow2.f32 %v2521_v1 }
 0x315   :  { %3245 = vpow2.f32 %v2522_v3 }
 0x317   :  { %v1139_v4 = vpop.f32.mrb[16].mxu0 }
 0x318   :  { %v2865_v6 = vpop.f32.mrb[17].mxu0  ;;  %v1140_v54 = vadd.f32 %v3624_v38, %v1139_v4 }
 0x31e   :  { %v3244_v8 = vpop.eup %3243 }
 0x31f   :  { %v1147_v11 = vadd.f32 1.0, %v3244_v8  ;;  %v3246_v33 = vpop.eup %3245 }
 0x320   :  { %v1154_v49 = vadd.f32 1.0, %v3246_v33 }
 0x321   :  { %3247 = vrcp.f32 %v1147_v11 }
 0x322   :  { %3249 = vrcp.f32 %v1154_v49 }
 0x32b   :  { %v3248_v14 = vpop.eup %3247 }
 0x32c   :  { %v1157_v45 = vmul.f32 %v3248_v14, %v1140_v54  ;;  %v3250_v16 = vpop.eup %3249 }
 0x32d   :  { %v1161_v21 = vsub.f32 1.0, %v3250_v16  ;;  %v1160_v23 = vmul.f32 %v3250_v16, %v3664_v44 }
 0x32e   :  { %v1158_v10 = vadd.f32 %v1157_v45, %v3599_v2 }
 0x330   :  { %3251 = vtanh.f32 %v1158_v10 }
 0x33a   :  { %v3252_v22 = vpop.eup %3251 }
 0x33b   :  { %v1162_v25 = vmul.f32 %v3252_v22, %v1161_v21 }
 0x33d   :  { %v3700_v27 = vadd.f32 %v1162_v25, %v1160_v23 }
 0x33f   :  { %2875 = vmatmul.mubr.msk.f32.vlgmr.msra.gmra.mrb[24].mxu1 %vm64_vm0, %v3700_v27  ;;  %2337 = vst.msk [vmem:[%s3947_s14 + $0x10] sm:$0xff] %vm64_vm0, %v3700_v27  ;;  %2886 = vmatmul.mubr.msk.f32.vlgmr.msra.gmra.mrb[18].mxu0 %vm64_vm0, %v3700_v27 }
 0x340   :  { %3131 = vmatpush3.bf16.msra.mxu1 %v3469_v20  ;;  %2896 = vmatprep.mubr.msk.f32.mxu1 %vm3332_vm2, %v3330_v0 }
 0x341   :  { %3132 = vmatprep.subr.bf16.mxu1 %v3331_v19  ;;  %3137 = vmatpush3.bf16.msra.mxu0 %v3492_v26 }
 0x342   :  { %3138 = vmatprep.subr.bf16.mxu0 %v3331_v19  ;;  %2907 = vmatprep.mubr.msk.f32.mxu0 %vm3332_vm2, %v3330_v0 }
 0x344   :  { %3134 = vmatpush3.bf16.msra.mxu1 %v3502_v29 }
 0x345   :  { %3141 = vmatprep.subr.bf16.mxu1 %v3331_v19  ;;  %3140 = vmatpush3.bf16.msra.mxu0 %v3509_v30 }
 0x346   :  { %3147 = vmatprep.subr.bf16.mxu0 %v3331_v19 }
 0x347   :  { %2897 = vmatmul.mubr.msk.f32.vlgmr.msra.gmra.mrb[26].mxu1 %vm64_vm0, %v3700_v27 }
 0x348   :  { %3143 = vmatpush3.bf16.msra.mxu1 %v3533_v34  ;;  %2918 = vmatprep.mubr.msk.f32.mxu1 %vm3332_vm2, %v3330_v0 }
 0x349   :  { %3144 = vmatprep.subr.bf16.mxu1 %v3331_v19 }
 0x34c   :  { %3146 = vmatpush3.bf16.msra.mxu1 %v3548_v37 }
 0x34d   :  { %3153 = vmatprep.subr.bf16.mxu1 %v3331_v19 }
 0x412   :  { %v1233_v2 = vpop.f32.mrb[24].mxu1  ;;  %v1303_v31 = vpop.f32.mrb[18].mxu0 }
 0x413   :  { %v1377_v32 = vadd.f32 %v1233_v2, %v3573_v41  ;;  %v1384_v35 = vadd.f32 %v1303_v31, %v3603_v7  ;;  %v2876_v36 = vpop.f32.mrb[25].mxu1  ;;  %v2887_v39 = vpop.f32.mrb[19].mxu0 }
 0x415   :  { %v2526_v40 = vmul.f32 -1.442695, %v1377_v32  ;;  %v2527_v43 = vmul.f32 -1.442695, %v1384_v35 }
 0x417   :  { %3253 = vpow2.f32 %v2526_v40 }
 0x418   :  { %3255 = vpow2.f32 %v2527_v43 }
 0x41a   :  { %v1373_v63 = vpop.f32.mrb[26].mxu1 }
 0x41b   :  { %v2898_v42 = vpop.f32.mrb[27].mxu1  ;;  %v1374_v53 = vadd.f32 %v3624_v38, %v1373_v63 }
 0x421   :  { %v3254_v46 = vpop.eup %3253 }
 0x422   :  { %v1381_v48 = vadd.f32 1.0, %v3254_v46  ;;  %v3256_v51 = vpop.eup %3255 }
 0x423   :  { %v1388_v52 = vadd.f32 1.0, %v3256_v51 }
 0x424   :  { %3257 = vrcp.f32 %v1381_v48 }
 0x425   :  { %3259 = vrcp.f32 %v1388_v52 }
 0x42e   :  { %v3258_v56 = vpop.eup %3257 }
 0x42f   :  { %v1391_v41 = vmul.f32 %v3258_v56, %v1374_v53  ;;  %v3260_v59 = vpop.eup %3259 }
 0x430   :  { %v1395_v60 = vsub.f32 1.0, %v3260_v59  ;;  %v1394_v62 = vmul.f32 %v3260_v59, %v3700_v27 }
 0x431   :  { %v1392_v7 = vadd.f32 %v1391_v41, %v3595_v61 }
 0x433   :  { %3261 = vtanh.f32 %v1392_v7 }
 0x43d   :  { %v3262_v58 = vpop.eup %3261 }
 0x43e   :  { %v1396_v1 = vmul.f32 %v3262_v58, %v1395_v60 }
 0x440   :  { %v3736_v3 = vadd.f32 %v1396_v1, %v1394_v62 }
 0x442   :  { %2908 = vmatmul.mubr.msk.f32.vlgmr.msra.gmra.mrb[20].mxu0 %vm64_vm0, %v3736_v3  ;;  %2338 = vst.msk [vmem:[%s3947_s14 + $0x18] sm:$0xff] %vm64_vm0, %v3736_v3  ;;  %2919 = vmatmul.mubr.msk.f32.vlgmr.msra.gmra.mrb[28].mxu1 %vm64_vm0, %v3736_v3 }
 0x443   :  { %3149 = vmatpush3.bf16.msra.mxu0 %v3469_v20  ;;  %2929 = vmatprep.mubr.msk.f32.mxu0 %vm3332_vm2, %v3330_v0 }
 0x444   :  { %3150 = vmatprep.subr.bf16.mxu0 %v3331_v19  ;;  %3155 = vmatpush3.bf16.msra.mxu1 %v3492_v26 }
 0x445   :  { %3156 = vmatprep.subr.bf16.mxu1 %v3331_v19  ;;  %2940 = vmatprep.mubr.msk.f32.mxu1 %vm3332_vm2, %v3330_v0 }
 0x447   :  { %3152 = vmatpush3.bf16.msra.mxu0 %v3502_v29 }
 0x448   :  { %3159 = vmatprep.subr.bf16.mxu0 %v3331_v19  ;;  %3158 = vmatpush3.bf16.msra.mxu1 %v3509_v30 }
 0x449   :  { %3165 = vmatprep.subr.bf16.mxu1 %v3331_v19 }
 0x44a   :  { %2930 = vmatmul.mubr.msk.f32.vlgmr.msra.gmra.mrb[22].mxu0 %vm64_vm0, %v3736_v3 }
 0x44b   :  { %3161 = vmatpush3.bf16.msra.mxu0 %v3533_v34  ;;  %2951 = vmatprep.mubr.msk.f32.mxu0 %vm3332_vm2, %v3330_v0 }
 0x44c   :  { %3162 = vmatprep.subr.bf16.mxu0 %v3331_v19 }
 0x44f   :  { %3164 = vmatpush3.bf16.msra.mxu0 %v3548_v37 }
 0x450   :  { %3171 = vmatprep.subr.bf16.mxu0 %v3331_v19 }
 0x515   :  { %v1467_v61 = vpop.f32.mrb[20].mxu0  ;;  %v1537_v4 = vpop.f32.mrb[28].mxu1 }
 0x516   :  { %v1611_v6 = vadd.f32 %v1467_v61, %v3584_v50  ;;  %v1618_v8 = vadd.f32 %v1537_v4, %v3615_v18  ;;  %v2909_v11 = vpop.f32.mrb[21].mxu0  ;;  %v2920_v33 = vpop.f32.mrb[29].mxu1 }
 0x518   :  { %v2531_v49 = vmul.f32 -1.442695, %v1611_v6  ;;  %v2532_v54 = vmul.f32 -1.442695, %v1618_v8 }
 0x51a   :  { %3263 = vpow2.f32 %v2531_v49 }
 0x51b   :  { %3265 = vpow2.f32 %v2532_v54 }
 0x51d   :  { %v1607_v14 = vpop.f32.mrb[22].mxu0 }
 0x51e   :  { %v2931_v45 = vpop.f32.mrb[23].mxu0  ;;  %v1608_v23 = vadd.f32 %v3624_v38, %v1607_v14 }
 0x524   :  { %v3264_v10 = vpop.eup %3263 }
 0x525   :  { %v1615_v16 = vadd.f32 1.0, %v3264_v10  ;;  %v3266_v21 = vpop.eup %3265 }
 0x526   :  { %v1622_v22 = vadd.f32 1.0, %v3266_v21 }
 0x527   :  { %3267 = vrcp.f32 %v1615_v16 }
 0x528   :  { %3269 = vrcp.f32 %v1622_v22 }
 0x531   :  { %v3268_v25 = vpop.eup %3267 }
 0x532   :  { %v1625_v50 = vmul.f32 %v3268_v25, %v1608_v23  ;;  %v3270_v2 = vpop.eup %3269 }
 0x533   :  { %v1629_v31 = vsub.f32 1.0, %v3270_v2  ;;  %v1628_v35 = vmul.f32 %v3270_v2, %v3736_v3 }
 0x534   :  { %v1626_v18 = vadd.f32 %v1625_v50, %v3605_v9 }
 0x536   :  { %3271 = vtanh.f32 %v1626_v18 }
 0x540   :  { %v3272_v32 = vpop.eup %3271 }
 0x541   :  { %v1630_v36 = vmul.f32 %v3272_v32, %v1629_v31 }
 0x543   :  { %v3772_v39 = vadd.f32 %v1630_v36, %v1628_v35 }
 0x545   :  { %2941 = vmatmul.mubr.msk.f32.vlgmr.msra.gmra.mrb[30].mxu1 %vm64_vm0, %v3772_v39  ;;  %2339 = vst.msk [vmem:[%s3947_s14 + $0x20] sm:$0xff] %vm64_vm0, %v3772_v39  ;;  %2952 = vmatmul.mubr.msk.f32.vlgmr.msra.gmra.mrb[24].mxu0 %vm64_vm0, %v3772_v39 }
 0x546   :  { %3167 = vmatpush3.bf16.msra.mxu1 %v3469_v20  ;;  %2962 = vmatprep.mubr.msk.f32.mxu1 %vm3332_vm2, %v3330_v0 }
 0x547   :  { %3168 = vmatprep.subr.bf16.mxu1 %v3331_v19  ;;  %3173 = vmatpush3.bf16.msra.mxu0 %v3492_v26 }
 0x548   :  { %3174 = vmatprep.subr.bf16.mxu0 %v3331_v19  ;;  %2973 = vmatprep.mubr.msk.f32.mxu0 %vm3332_vm2, %v3330_v0 }
 0x54a   :  { %3170 = vmatpush3.bf16.msra.mxu1 %v3502_v29 }
 0x54b   :  { %3177 = vmatprep.subr.bf16.mxu1 %v3331_v19  ;;  %3176 = vmatpush3.bf16.msra.mxu0 %v3509_v30 }
 0x54c   :  { %3183 = vmatprep.subr.bf16.mxu0 %v3331_v19 }
 0x54d   :  { %2963 = vmatmul.mubr.msk.f32.vlgmr.msra.gmra.mrb[32].mxu1 %vm64_vm0, %v3772_v39 }
 0x54e   :  { %3179 = vmatpush3.bf16.msra.mxu1 %v3533_v34  ;;  %2984 = vmatprep.mubr.msk.f32.mxu1 %vm3332_vm2, %v3330_v0 }
 0x54f   :  { %3180 = vmatprep.subr.bf16.mxu1 %v3331_v19 }
 0x552   :  { %3182 = vmatpush3.bf16.msra.mxu1 %v3548_v37 }
 0x553   :  { %3189 = vmatprep.subr.bf16.mxu1 %v3331_v19 }
 0x618   :  { %v1701_v9 = vpop.f32.mrb[30].mxu1  ;;  %v1771_v40 = vpop.f32.mrb[24].mxu0 }
 0x619   :  { %v1845_v43 = vadd.f32 %v1701_v9, %v3579_v47  ;;  %v1852_v63 = vadd.f32 %v1771_v40, %v3611_v15  ;;  %v2942_v42 = vpop.f32.mrb[31].mxu1  ;;  %v2953_v46 = vpop.f32.mrb[25].mxu0  ;;  %v2345_v9 = vld [vmem:[%s3944_s11 + $0x10] sm:$0xff]  ;;  %v2346_v40 = vld [vmem:[%s3944_s11 + $0x18] sm:$0xff] }
 0x61b   :  { %v2536_v48 = vmul.f32 -1.442695, %v1845_v43  ;;  %v2537_v51 = vmul.f32 -1.442695, %v1852_v63  ;;  %v3211_v63 = vpack.c.bf16 %v2346_v40, %v2345_v9 }
 0x61d   :  { %3273 = vpow2.f32 %v2536_v48 }
 0x61e   :  { %3275 = vpow2.f32 %v2537_v51 }
 0x620   :  { %v1841_v52 = vpop.f32.mrb[32].mxu1 }
 0x621   :  { %v2964_v53 = vpop.f32.mrb[33].mxu1  ;;  %v1842_v60 = vadd.f32 %v3624_v38, %v1841_v52 }
 0x627   :  { %v3274_v56 = vpop.eup %3273 }
 0x628   :  { %v1849_v41 = vadd.f32 1.0, %v3274_v56  ;;  %v3276_v7 = vpop.eup %3275 }
 0x629   :  { %v1856_v59 = vadd.f32 1.0, %v3276_v7 }
 0x62a   :  { %3277 = vrcp.f32 %v1849_v41 }
 0x62b   :  { %3279 = vrcp.f32 %v1856_v59 }
 0x634   :  { %v3278_v58 = vpop.eup %3277 }
 0x635   :  { %v1859_v47 = vmul.f32 %v3278_v58, %v1842_v60  ;;  %v3280_v62 = vpop.eup %3279 }
 0x636   :  { %v1863_v1 = vsub.f32 1.0, %v3280_v62  ;;  %v1862_v4 = vmul.f32 %v3280_v62, %v3772_v39 }
 0x637   :  { %v1860_v15 = vadd.f32 %v1859_v47, %v3601_v5 }
 0x639   :  { %3281 = vtanh.f32 %v1860_v15 }
 0x643   :  { %v3282_v61 = vpop.eup %3281 }
 0x644   :  { %v1864_v6 = vmul.f32 %v3282_v61, %v1863_v1 }
 0x646   :  { %v3808_v8 = vadd.f32 %v1864_v6, %v1862_v4 }
 0x648   :  { %2974 = vmatmul.mubr.msk.f32.vlgmr.msra.gmra.mrb[26].mxu0 %vm64_vm0, %v3808_v8  ;;  %2340 = vst.msk [vmem:[%s3947_s14 + $0x28] sm:$0xff] %vm64_vm0, %v3808_v8  ;;  %2985 = vmatmul.mubr.msk.f32.vlgmr.msra.gmra.mrb[34].mxu1 %vm64_vm0, %v3808_v8 }
 0x649   :  { %3185 = vmatpush3.bf16.msra.mxu0 %v3469_v20  ;;  %2995 = vmatprep.mubr.msk.f32.mxu0 %vm3332_vm2, %v3330_v0 }
 0x64a   :  { %3186 = vmatprep.subr.bf16.mxu0 %v3331_v19  ;;  %3191 = vmatpush3.bf16.msra.mxu1 %v3492_v26  ;;  %v2343_v26 = vld [vmem:[%s3944_s11] sm:$0xff] }
 0x64b   :  { %3192 = vmatprep.subr.bf16.mxu1 %v3331_v19  ;;  %3006 = vmatprep.mubr.msk.f32.mxu1 %vm3332_vm2, %v3330_v0 }
 0x64d   :  { %3188 = vmatpush3.bf16.msra.mxu0 %v3502_v29 }
 0x64e   :  { %3195 = vmatprep.subr.bf16.mxu0 %v3331_v19  ;;  %3194 = vmatpush3.bf16.msra.mxu1 %v3509_v30  ;;  %v2344_v30 = vld [vmem:[%s3944_s11 + $0x8] sm:$0xff] }
 0x64f   :  { %3201 = vmatprep.subr.bf16.mxu1 %v3331_v19  ;;  %v3207_v5 = vpack.c.bf16 %v2344_v30, %v2343_v26 }
 0x650   :  { %2996 = vmatmul.mubr.msk.f32.vlgmr.msra.gmra.mrb[28].mxu0 %vm64_vm0, %v3808_v8 }
 0x651   :  { %3197 = vmatpush3.bf16.msra.mxu0 %v3533_v34  ;;  %3017 = vmatprep.mubr.msk.f32.mxu0 %vm3332_vm2, %v3330_v0 }
 0x652   :  { %3198 = vmatprep.subr.bf16.mxu0 %v3331_v19 }
 0x655   :  { %3200 = vmatpush3.bf16.msra.mxu0 %v3548_v37 }
 0x656   :  { %3208 = vmatprep.subr.bf16.mxu0 %v3207_v5 }
 0x71b   :  { %v1935_v11 = vpop.f32.mrb[26].mxu0  ;;  %v2005_v33 = vpop.f32.mrb[34].mxu1 }
 0x71c   :  { %v2079_v34 = vadd.f32 %v1935_v11, %v3590_v57  ;;  %v2086_v49 = vadd.f32 %v2005_v33, %v3619_v28  ;;  %v2975_v54 = vpop.f32.mrb[27].mxu0  ;;  %v2986_v14 = vpop.f32.mrb[35].mxu1 }
 0x71e   :  { %v2541_v45 = vmul.f32 -1.442695, %v2079_v34  ;;  %v2542_v37 = vmul.f32 -1.442695, %v2086_v49 }
 0x720   :  { %3283 = vpow2.f32 %v2541_v45 }
 0x721   :  { %3285 = vpow2.f32 %v2542_v37 }
 0x723   :  { %v2075_v10 = vpop.f32.mrb[28].mxu0 }
 0x724   :  { %v2997_v16 = vpop.f32.mrb[29].mxu0  ;;  %v2076_v50 = vadd.f32 %v3624_v38, %v2075_v10 }
 0x72a   :  { %v3284_v21 = vpop.eup %3283 }
 0x72b   :  { %v2083_v22 = vadd.f32 1.0, %v3284_v21  ;;  %v3286_v23 = vpop.eup %3285 }
 0x72c   :  { %v2090_v25 = vadd.f32 1.0, %v3286_v23 }
 0x72d   :  { %3287 = vrcp.f32 %v2083_v22 }
 0x72e   :  { %3289 = vrcp.f32 %v2090_v25 }
 0x737   :  { %v3288_v18 = vpop.eup %3287 }
 0x738   :  { %v2093_v57 = vmul.f32 %v3288_v18, %v2076_v50  ;;  %v3290_v2 = vpop.eup %3289 }
 0x739   :  { %v2097_v31 = vsub.f32 1.0, %v3290_v2  ;;  %v2096_v35 = vmul.f32 %v3290_v2, %v3808_v8 }
 0x73a   :  { %v2094_v28 = vadd.f32 %v2093_v57, %v3613_v17 }
 0x73c   :  { %3291 = vtanh.f32 %v2094_v28 }
 0x746   :  { %v3292_v32 = vpop.eup %3291 }
 0x747   :  { %v2098_v36 = vmul.f32 %v3292_v32, %v2097_v31 }
 0x749   :  { %v3855_v43 = vadd.f32 %v2098_v36, %v2096_v35 }
 0x74b   :  { %3007 = vmatmul.mubr.msk.f32.vlgmr.msra.gmra.mrb[36].mxu1 %vm64_vm0, %v3855_v43  ;;  %2341 = vst.msk [vmem:[%s3947_s14 + $0x30] sm:$0xff] %vm64_vm0, %v3855_v43  ;;  %3018 = vmatmul.mubr.msk.f32.vlgmr.msra.gmra.mrb[30].mxu0 %vm64_vm0, %v3855_v43 }
 0x74c   :  { %3203 = vmatpush3.bf16.msra.mxu1 %v3469_v20  ;;  %3210 = vmatpush3.bf16.msra.mxu0 %v3207_v5 }
 0x74d   :  { %3039 = vmatprep.mubr.msk.f32.mxu0 %vm64_vm0, %v3628_v12  ;;  %3204 = vmatprep.subr.bf16.mxu1 %v3331_v19 }
 0x74e   :  { %3212 = vmatprep.subr.bf16.mxu0 %v3211_v63  ;;  %3028 = vmatprep.mubr.msk.f32.mxu1 %vm3332_vm2, %v3330_v0 }
 0x750   :  { %3206 = vmatpush3.bf16.msra.mxu1 %v3502_v29  ;;  %3214 = vmatpush3.bf16.msra.mxu0 %v3211_v63 }
 0x753   :  { %3029 = vmatmul.mubr.msk.f32.vlgmr.msra.gmra.mrb[38].mxu1 %vm64_vm0, %v3855_v43  ;;  %3040 = vmatmul.mubr.msk.f32.vlgmr.msra.gmra.mrb[32].mxu0 %vm64_vm0, %v3664_v44 }
 0x754   :  { %3042 = vmatprep.mubr.msk.f32.mxu0 %vm64_vm0, %v3700_v27  ;;  %v2548_v27 = vld [vmem:[%s3945_s12] ss:$0 sm:$0xff] }
 0x757   :  { %3043 = vmatmul.mubr.msk.f32.gmra.mrb[34].mxu0 %vm64_vm0, %v3736_v3 }
 0x758   :  { %3045 = vmatprep.mubr.msk.f32.mxu0 %vm64_vm0, %v3772_v39 }
 0x75b   :  { %3046 = vmatmul.mubr.msk.f32.gmra.mrb[36].mxu0 %vm64_vm0, %v3808_v8 }
 0x75c   :  { %3048 = vmatprep.mubr.msk.f32.mxu0 %vm64_vm0, %v3855_v43 }
 0x81e   :  { %v2169_v0 = vpop.f32.mrb[36].mxu1  ;;  %v2239_v19 = vpop.f32.mrb[30].mxu0 }
 0x81f   :  { %v2313_v20 = vadd.f32 %v2169_v0, %v3588_v55  ;;  %v2320_v29 = vadd.f32 %v2239_v19, %v3617_v24  ;;  %v3008_v17 = vpop.f32.mrb[37].mxu1  ;;  %v3019_v12 = vpop.f32.mrb[31].mxu0 }
 0x821   :  { %v2546_v44 = vmul.f32 -1.442695, %v2313_v20  ;;  %v2547_v3 = vmul.f32 -1.442695, %v2320_v29 }
 0x823   :  { %3293 = vpow2.f32 %v2546_v44 }
 0x824   :  { %3295 = vpow2.f32 %v2547_v3 }
 0x826   :  { %v2309_v39 = vpop.f32.mrb[38].mxu1  ;;  %v3041_v42 = vpop.f32.mrb[32].mxu0 }
 0x827   :  { %v2429_v46 = vadd.f32 %v3041_v42, %v2548_v27  ;;  %v3030_v48 = vpop.f32.mrb[39].mxu1  ;;  %v2423_v51 = vpop.f32.mrb[33].mxu0  ;;  %v2310_v1 = vadd.f32 %v3624_v38, %v2309_v39 }
 0x828   :  { %v2424_v52 = vadd.f32 %v2548_v27, %v2423_v51 }
 0x829   :  { %2464 = vst.msk [vmem:[%s3946_s13 + $0x8] sm:$0xff] %vm2462_vm3, %v2429_v46 }
 0x82a   :  { %2463 = vst.msk [vmem:[%s3946_s13] sm:$0xff] %vm2462_vm3, %v2424_v52  ;;  %v3044_v55 = vpop.f32.mrb[34].mxu0 }
 0x82b   :  { %v2439_v24 = vadd.f32 %v3044_v55, %v2548_v27  ;;  %v2433_v53 = vpop.f32.mrb[35].mxu0 }
 0x82c   :  { %v2434_v56 = vadd.f32 %v2548_v27, %v2433_v53 }
 0x82d   :  { %v3294_v41 = vpop.eup %3293  ;;  %2466 = vst.msk [vmem:[%s3946_s13 + $0x18] sm:$0xff] %vm2462_vm3, %v2439_v24 }
 0x82e   :  { %v2317_v7 = vadd.f32 1.0, %v3294_v41  ;;  %2465 = vst.msk [vmem:[%s3946_s13 + $0x10] sm:$0xff] %vm2462_vm3, %v2434_v56  ;;  %v3047_v59 = vpop.f32.mrb[36].mxu0  ;;  %v3296_v15 = vpop.eup %3295 }
 0x82f   :  { %v2449_v60 = vadd.f32 %v3047_v59, %v2548_v27  ;;  %v2443_v58 = vpop.f32.mrb[37].mxu0  ;;  %v2324_v62 = vadd.f32 1.0, %v3296_v15 }
 0x830   :  { %3297 = vrcp.f32 %v2317_v7  ;;  %v2444_v47 = vadd.f32 %v2548_v27, %v2443_v58 }
 0x831   :  { %2468 = vst.msk [vmem:[%s3946_s13 + $0x28] sm:$0xff] %vm2462_vm3, %v2449_v60  ;;  %3299 = vrcp.f32 %v2324_v62 }
 0x832   :  { %2467 = vst.msk [vmem:[%s3946_s13 + $0x20] sm:$0xff] %vm2462_vm3, %v2444_v47 }
 0x83a   :  { %v3298_v61 = vpop.eup %3297 }
 0x83b   :  { %v2327_v4 = vmul.f32 %v3298_v61, %v2310_v1  ;;  %v3300_v8 = vpop.eup %3299 }
 0x83c   :  { %v2331_v26 = vsub.f32 1.0, %v3300_v8  ;;  %v2330_v5 = vmul.f32 %v3300_v8, %v3855_v43 }
 0x83d   :  { %v2328_v6 = vadd.f32 %v2327_v4, %v3609_v13 }
 0x83f   :  { %3301 = vtanh.f32 %v2328_v6 }
 0x849   :  { %v3302_v30 = vpop.eup %3301 }
 0x84a   :  { %v2332_v11 = vmul.f32 %v3302_v30, %v2331_v26 }
 0x84c   :  { %v2333_v33 = vadd.f32 %v2332_v11, %v2330_v5 }
 0x84e   :  { %2334 = vst.msk [vmem:[#allocation2] sm:$0xff] %vm64_vm0, %v2333_v33  ;;  %2342 = vst.msk [vmem:[%s3947_s14 + $0x38] sm:$0xff] %vm64_vm0, %v2333_v33  ;;  %3049 = vmatmul.mubr.msk.f32.gmra.mrb[38].mxu0 %vm64_vm0, %v2333_v33 }
 0x921   :  { %v3050_v38 = vpop.f32.mrb[38].mxu0 }
 0x922   :  { %v2459_v34 = vadd.f32 %v3050_v38, %v2548_v27  ;;  %v2453_v13 = vpop.f32.mrb[39].mxu0 }
 0x923   :  { %v2454_v49 = vadd.f32 %v2548_v27, %v2453_v13 }
 0x924   :  { %2470 = vst.msk [vmem:[%s3946_s13 + $0x38] sm:$0xff] %vm2462_vm3, %v2459_v34 }
 0x925   :  { %2469 = vst.msk [vmem:[%s3946_s13 + $0x30] sm:$0xff] %vm2462_vm3, %v2454_v49 }
 0x926   :  { %2479 = vsyncpa [#allocation4], 1 }

</bundles_post_ra>
